<compile_context>
chip_gen: v7x
topology: tpu7x:2x2x1
jax: 0.10.0
libtpu: 0.0.40
codegen_flags: <defaults>
</compile_context>

<pallas_src>
import functools

import jax
import jax.numpy as jnp
from jax.experimental import pallas as pl
from jax.experimental.pallas import tpu as pltpu


PARAM_ORDER = (
    "ln1_g", "ln1_b",        # (1, D)
    "wqkv", "bqkv",          # (D, 3D), (1, 3D)  fused Q/K/V projection
    "wo", "bo",              # (D, D), (1, D)
    "ln2_g", "ln2_b",        # (1, D)
    "w1", "b1",              # (D, F), (1, F)
    "w2", "b2",              # (F, D), (1, D)
)


# --------------------------------- kernel ---------------------------------- #
def fused_encoder_kernel(
    x_ref,                                   # (Bt*S, D) input slab (read at layer 0)
    ln1_g, ln1_b, wqkv, bqkv, wo, bo,
    ln2_g, ln2_b, w1, b1, w2, b2,            # current layer's params (layer dim squeezed)
    o_ref,                                   # (Bt*S, D) output slab (written at last layer)
    act_ref,                                 # VMEM f32 (Bt*S, D): residual-stream carry
    *, batch_block: int, seq_len: int, num_heads: int,
    eps: float, kv_block: int, ff_block: int,
):
    layer = pl.program_id(1)
    num_layers = pl.num_programs(1)

    Bt, S, H = batch_block, seq_len, num_heads
    M, D = act_ref.shape
    dk = D // H
    F = w1.shape[-1]
    scale = 1.0 / (dk ** 0.5)

    # Layer 0: load the residual stream into the f32 VMEM carry buffer.
    @pl.when(layer == 0)
    def _():
        act_ref[...] = x_ref[...].astype(jnp.float32)

    x = act_ref[...]                                             # (M, D) float32

    # Hoist small per-layer params once (JAX does not CSE broadcasts).
    g1 = ln1_g[...].astype(jnp.float32)
    be1 = ln1_b[...].astype(jnp.float32)
    g2 = ln2_g[...].astype(jnp.float32)
    be2 = ln2_b[...].astype(jnp.float32)
    bias_qkv = bqkv[...].astype(jnp.float32)
    bias_o = bo[...].astype(jnp.float32)
    bias_2 = b2[...].astype(jnp.float32)

    def layer_norm(v, g, b):
        mu = jnp.mean(v, axis=-1, keepdims=True)
        cent = v - mu
        var = jnp.mean(cent * cent, axis=-1, keepdims=True)
        return cent * jax.lax.rsqrt(var + eps) * g + b

    # ------ sublayer 1: Pre-LN fused-QKV multi-head self-attention + residual ------ #
    h = layer_norm(x, g1, be1)
    qkv = jnp.dot(h, wqkv[...].astype(jnp.float32),
                  preferred_element_type=jnp.float32) + bias_qkv   # (M, 3D)

    def to_heads(t):                                               # (M, D) -> (Bt*H, S, dk)
        return jnp.swapaxes(t.reshape(Bt, S, H, dk), 1, 2).reshape(Bt * H, S, dk)

    q = to_heads(qkv[:, :D] * scale)     # fold 1/sqrt(dk) into Q: O(M*D), not O(S^2) per head
    k = to_heads(qkv[:, D:2 * D])
    v = to_heads(qkv[:, 2 * D:])

    # Flash-style online softmax over KV tiles (live scores bounded to (Bt*H, S, kv_block)).
    m_i = jnp.full((Bt * H, S, 1), -jnp.inf, dtype=jnp.float32)
    l_i = jnp.zeros((Bt * H, S, 1), dtype=jnp.float32)
    acc = jnp.zeros((Bt * H, S, dk), dtype=jnp.float32)
    for t in range(S // kv_block):                                 # static unroll
        kt = k[:, t * kv_block:(t + 1) * kv_block, :]
        vt = v[:, t * kv_block:(t + 1) * kv_block, :]
        s = jnp.einsum("bqd,bkd->bqk", q, kt,
                       preferred_element_type=jnp.float32)
        m_new = jnp.maximum(m_i, jnp.max(s, axis=-1, keepdims=True))
        alpha = jnp.exp(m_i - m_new)
        p = jnp.exp(s - m_new)
        l_i = alpha * l_i + jnp.sum(p, axis=-1, keepdims=True)
        acc = alpha * acc + jnp.einsum("bqk,bkd->bqd", p, vt,
                                       preferred_element_type=jnp.float32)
        m_i = m_new
    attn = acc * pl.reciprocal(l_i, approx=True)                   # divide on the EUP slot
    attn = jnp.swapaxes(attn.reshape(Bt, H, S, dk), 1, 2).reshape(M, D)

    attn = jnp.dot(attn, wo[...].astype(jnp.float32),
                   preferred_element_type=jnp.float32) + bias_o
    x = x + attn                                                   # dropout1 == identity (eval)

    # ------ sublayer 2: Pre-LN FFN, tiled over d_ff, + residual ------ #
    h2 = layer_norm(x, g2, be2)
    ff = jnp.zeros((M, D), dtype=jnp.float32)
    for t in range(F // ff_block):                                 # static unroll
        w1_t = w1[:, pl.ds(t * ff_block, ff_block)].astype(jnp.float32)
        b1_t = b1[:, pl.ds(t * ff_block, ff_block)].astype(jnp.float32)
        w2_t = w2[pl.ds(t * ff_block, ff_block), :].astype(jnp.float32)
        hid = jnp.maximum(
            jnp.dot(h2, w1_t, preferred_element_type=jnp.float32) + b1_t, 0.0)   # relu
        ff = ff + jnp.dot(hid, w2_t, preferred_element_type=jnp.float32)
    x = x + ff + bias_2                                            # dropout2 == identity (eval)

    # Carry residual stream to the next layer; emit output at the last layer.
    act_ref[...] = x

    @pl.when(layer == num_layers - 1)
    def _():
        o_ref[...] = x.astype(o_ref.dtype)


# --------------------------------- wrapper --------------------------------- #
def _largest_divisor_at_most(n, cap):
    for d in range(min(n, cap), 0, -1):
        if n % d == 0:
            return d
    return 1


def transformer_encoder_pallas(x, stacked_params, num_heads, *,
                               batch_block=None, kv_block=None, ff_block=None,
                               eps=1e-5, interpret=False):
    """Full encoder stack (final norm=None) as ONE fused pallas_call.

    x: (B, S, D). stacked_params: tuple in PARAM_ORDER, each with leading num_layers axis.
    """
    B, S, D = x.shape
    assert D % num_heads == 0, "d_model must be divisible by num_heads"
    L = stacked_params[0].shape[0]
    F = stacked_params[PARAM_ORDER.index("w1")].shape[-1]

    if batch_block is None:                       # pack batch elements into matmul-M
        batch_block = _largest_divisor_at_most(B, max(1, 1024 // S))
    if kv_block is None:                          # bound live (S, kv_block) score tile
        kv_block = _largest_divisor_at_most(S, 512)
    if ff_block is None:                          # bound live (M, ff_block) intermediate
        ff_block = _largest_divisor_at_most(F, 2048)

    Bt = batch_block
    M = Bt * S

    kern = functools.partial(
        fused_encoder_kernel,
        batch_block=Bt, seq_len=S, num_heads=num_heads,
        eps=eps, kv_block=kv_block, ff_block=ff_block)

    def param_spec(arr):
        per_layer = tuple(arr.shape[1:])
        nd = len(per_layer)
        # Leading layer axis squeezed; index_map selects the current layer.
        return pl.BlockSpec((None,) + per_layer,
                            lambda b, l, _nd=nd: (l,) + (0,) * _nd)

    x2 = x.reshape(B * S, D)                      # lane/sublane-dense 2-D activation slab

    in_specs = [pl.BlockSpec((M, D), lambda b, l: (b, 0))]
    in_specs += [param_spec(p) for p in stacked_params]

    out2 = pl.pallas_call(
        kern,
        out_shape=jax.ShapeDtypeStruct((B * S, D), x.dtype),
        grid=(B // Bt, L),
        in_specs=in_specs,
        out_specs=pl.BlockSpec((M, D), lambda b, l: (b, 0)),
        scratch_shapes=[pltpu.VMEM((M, D), jnp.float32)],
        compiler_params=pltpu.CompilerParams(
            dimension_semantics=("parallel", "arbitrary"),
            vmem_limit_bytes=64 * 1024 * 1024),
        interpret=interpret,
    )(x2, *stacked_params)
    return out2.reshape(B, S, D)


# --------------------------- deterministic params --------------------------- #
def init_layer_params(key, d_model, d_ff, init_std=0.02, param_dtype=jnp.bfloat16):
    ks = jax.random.split(key, 6)
    lin = lambda k, shp: init_std * jax.random.normal(k, shp, jnp.float32)
    D, F = d_model, d_ff
    p = {
        "ln1_g": jnp.ones((1, D), jnp.float32),
        "ln1_b": jnp.zeros((1, D), jnp.float32),
        "wqkv": jnp.concatenate(
            [lin(ks[0], (D, D)), lin(ks[1], (D, D)), lin(ks[2], (D, D))], axis=1),
        "bqkv": jnp.zeros((1, 3 * D), jnp.float32),
        "wo": lin(ks[3], (D, D)),
        "bo": jnp.zeros((1, D), jnp.float32),
        "ln2_g": jnp.ones((1, D), jnp.float32),
        "ln2_b": jnp.zeros((1, D), jnp.float32),
        "w1": lin(ks[4], (D, F)),
        "b1": jnp.zeros((1, F), jnp.float32),
        "w2": lin(ks[5], (F, D)),
        "b2": jnp.zeros((1, D), jnp.float32),
    }
    # bf16 storage: halves HBM weight traffic & VMEM residency; kernel computes in f32.
    return {k: v.astype(param_dtype) for k, v in p.items()}


def stack_layer_params(layer_param_dicts):
    return tuple(jnp.stack([lp[name] for lp in layer_param_dicts], axis=0)
                 for name in PARAM_ORDER)


# ---------------------------- pure-JAX reference ---------------------------- #
def _ref_forward(x, stacked_params, num_heads, eps=1e-5):
    params = [p.astype(jnp.float32) for p in stacked_params]
    (ln1g, ln1b, wqkv, bqkv, wo, bo, ln2g, ln2b, w1, b1, w2, b2) = params
    L = ln1g.shape[0]
    B, S, D = x.shape
    H = num_heads
    dk = D // H

    def ln(v, g, b):
        mu = v.mean(-1, keepdims=True)
        var = ((v - mu) ** 2).mean(-1, keepdims=True)
        return (v - mu) / jnp.sqrt(var + eps) * g + b

    out = x.astype(jnp.float32)
    for i in range(L):
        h = ln(out, ln1g[i], ln1b[i])
        qkv = h @ wqkv[i] + bqkv[i]
        q = qkv[..., :D].reshape(B, S, H, dk).transpose(0, 2, 1, 3)
        k = qkv[..., D:2 * D].reshape(B, S, H, dk).transpose(0, 2, 1, 3)
        v = qkv[..., 2 * D:].reshape(B, S, H, dk).transpose(0, 2, 1, 3)
        s = jnp.einsum("bhqd,bhkd->bhqk", q, k) / (dk ** 0.5)
        p = jax.nn.softmax(s, axis=-1)
        a = jnp.einsum("bhqk,bhkd->bhqd", p, v).transpose(0, 2, 1, 3).reshape(B, S, D)
        out = out + (a @ wo[i] + bo[i])
        h2 = ln(out, ln2g[i], ln2b[i])
        ff = jnp.maximum(h2 @ w1[i] + b1[i], 0.0) @ w2[i] + b2[i]
        out = out + ff
    return out.astype(x.dtype)


# ----------------------------------- main ----------------------------------- #
if __name__ == "__main__":
    B, S, d_model, num_heads, d_ff, num_layers = 2, 8, 32, 4, 64, 2

    key = jax.random.PRNGKey(0)
    key, xk = jax.random.split(key)
    x = jax.random.normal(xk, (B, S, d_model), dtype=jnp.float32)

    layer_keys = jax.random.split(key, num_layers)
    layer_params = [init_layer_params(k, d_model, d_ff) for k in layer_keys]
    stacked = stack_layer_params(layer_params)

    out = transformer_encoder_pallas(x, stacked, num_heads)
    out = jax.block_until_ready(out)

    ref = _ref_forward(x, stacked, num_heads)
    assert out.shape == (B, S, d_model)
    assert jnp.allclose(out, ref, atol=2e-3, rtol=2e-3), "mismatch vs reference"

    print("KERNEL_OK")
</pallas_src>

<mosaic_0001>
module attributes {stable_mosaic.version = 11 : i64} {
  func.func @fused_encoder_kernel(%arg0: i32, %arg1: i32, %arg2: memref<16x32xf32, #tpu.memory_space<vmem>>, %arg3: memref<1x1x32xbf16, #tpu.memory_space<vmem>>, %arg4: memref<1x1x32xbf16, #tpu.memory_space<vmem>>, %arg5: memref<1x32x96xbf16, #tpu.memory_space<vmem>>, %arg6: memref<1x1x96xbf16, #tpu.memory_space<vmem>>, %arg7: memref<1x32x32xbf16, #tpu.memory_space<vmem>>, %arg8: memref<1x1x32xbf16, #tpu.memory_space<vmem>>, %arg9: memref<1x1x32xbf16, #tpu.memory_space<vmem>>, %arg10: memref<1x1x32xbf16, #tpu.memory_space<vmem>>, %arg11: memref<1x32x64xbf16, #tpu.memory_space<vmem>>, %arg12: memref<1x1x64xbf16, #tpu.memory_space<vmem>>, %arg13: memref<1x64x32xbf16, #tpu.memory_space<vmem>>, %arg14: memref<1x1x32xbf16, #tpu.memory_space<vmem>>, %arg15: memref<16x32xf32, #tpu.memory_space<vmem>>, %arg16: memref<16x32xf32, #tpu.memory_space<vmem>>) attributes {dimension_semantics = [#tpu.dimension_semantics<parallel>, #tpu.dimension_semantics<arbitrary>], iteration_bounds = array<i64: 1, 2>, scalar_prefetch = 0 : i64, scratch_operands = 1 : i64, tpu.core_type = #tpu.core_type<tc>, window_params = [{transform_indices = @transform_0, window_bounds = array<i64: 16, 32>}, {transform_indices = @transform_1, window_bounds = array<i64: 1, 1, 32>}, {transform_indices = @transform_2, window_bounds = array<i64: 1, 1, 32>}, {transform_indices = @transform_3, window_bounds = array<i64: 1, 32, 96>}, {transform_indices = @transform_4, window_bounds = array<i64: 1, 1, 96>}, {transform_indices = @transform_5, window_bounds = array<i64: 1, 32, 32>}, {transform_indices = @transform_6, window_bounds = array<i64: 1, 1, 32>}, {transform_indices = @transform_7, window_bounds = array<i64: 1, 1, 32>}, {transform_indices = @transform_8, window_bounds = array<i64: 1, 1, 32>}, {transform_indices = @transform_9, window_bounds = array<i64: 1, 32, 64>}, {transform_indices = @transform_10, window_bounds = array<i64: 1, 1, 64>}, {transform_indices = @transform_11, window_bounds = array<i64: 1, 64, 32>}, {transform_indices = @transform_12, window_bounds = array<i64: 1, 1, 32>}, {transform_indices = @transform_13, window_bounds = array<i64: 16, 32>}]} {
    %c0_i32 = arith.constant 0 : i32
    %0 = arith.cmpi eq, %arg1, %c0_i32 : i32
    %1 = arith.extui %0 : i1 to i32
    %c0_i32_0 = arith.constant 0 : i32
    %2 = arith.cmpi ne, %1, %c0_i32_0 : i32
    scf.if %2 {
      %c0_64 = arith.constant 0 : index
      %c0_65 = arith.constant 0 : index
      %142 = vector.load %arg2[%c0_64, %c0_65] : memref<16x32xf32, #tpu.memory_space<vmem>>, vector<16x32xf32>
      %c0_66 = arith.constant 0 : index
      %c0_67 = arith.constant 0 : index
      %143 = vector.load %arg16[%c0_66, %c0_67] : memref<16x32xf32, #tpu.memory_space<vmem>>, vector<16x32xf32>
      tpu.vector_store %arg16[%c0_66, %c0_67], %142 {strides = array<i32>} : memref<16x32xf32, #tpu.memory_space<vmem>>, vector<16x32xf32>,
    } else {
    }
    %c0 = arith.constant 0 : index
    %c0_1 = arith.constant 0 : index
    %3 = vector.load %arg16[%c0, %c0_1] : memref<16x32xf32, #tpu.memory_space<vmem>>, vector<16x32xf32>
    %c0_2 = arith.constant 0 : index
    %c0_3 = arith.constant 0 : index
    %c0_4 = arith.constant 0 : index
    %4 = vector.load %arg3[%c0_2, %c0_3, %c0_4] : memref<1x1x32xbf16, #tpu.memory_space<vmem>>, vector<1x1x32xbf16>
    %5 = vector.shape_cast %4 : vector<1x1x32xbf16> to vector<1x32xbf16>
    %6 = arith.extf %5 : vector<1x32xbf16> to vector<1x32xf32>
    %c0_5 = arith.constant 0 : index
    %c0_6 = arith.constant 0 : index
    %c0_7 = arith.constant 0 : index
    %7 = vector.load %arg4[%c0_5, %c0_6, %c0_7] : memref<1x1x32xbf16, #tpu.memory_space<vmem>>, vector<1x1x32xbf16>
    %8 = vector.shape_cast %7 : vector<1x1x32xbf16> to vector<1x32xbf16>
    %9 = arith.extf %8 : vector<1x32xbf16> to vector<1x32xf32>
    %c0_8 = arith.constant 0 : index
    %c0_9 = arith.constant 0 : index
    %c0_10 = arith.constant 0 : index
    %10 = vector.load %arg9[%c0_8, %c0_9, %c0_10] : memref<1x1x32xbf16, #tpu.memory_space<vmem>>, vector<1x1x32xbf16>
    %11 = vector.shape_cast %10 : vector<1x1x32xbf16> to vector<1x32xbf16>
    %12 = arith.extf %11 : vector<1x32xbf16> to vector<1x32xf32>
    %c0_11 = arith.constant 0 : index
    %c0_12 = arith.constant 0 : index
    %c0_13 = arith.constant 0 : index
    %13 = vector.load %arg10[%c0_11, %c0_12, %c0_13] : memref<1x1x32xbf16, #tpu.memory_space<vmem>>, vector<1x1x32xbf16>
    %14 = vector.shape_cast %13 : vector<1x1x32xbf16> to vector<1x32xbf16>
    %15 = arith.extf %14 : vector<1x32xbf16> to vector<1x32xf32>
    %c0_14 = arith.constant 0 : index
    %c0_15 = arith.constant 0 : index
    %c0_16 = arith.constant 0 : index
    %16 = vector.load %arg6[%c0_14, %c0_15, %c0_16] : memref<1x1x96xbf16, #tpu.memory_space<vmem>>, vector<1x1x96xbf16>
    %17 = vector.shape_cast %16 : vector<1x1x96xbf16> to vector<1x96xbf16>
    %18 = arith.extf %17 : vector<1x96xbf16> to vector<1x96xf32>
    %c0_17 = arith.constant 0 : index
    %c0_18 = arith.constant 0 : index
    %c0_19 = arith.constant 0 : index
    %19 = vector.load %arg8[%c0_17, %c0_18, %c0_19] : memref<1x1x32xbf16, #tpu.memory_space<vmem>>, vector<1x1x32xbf16>
    %20 = vector.shape_cast %19 : vector<1x1x32xbf16> to vector<1x32xbf16>
    %21 = arith.extf %20 : vector<1x32xbf16> to vector<1x32xf32>
    %c0_20 = arith.constant 0 : index
    %c0_21 = arith.constant 0 : index
    %c0_22 = arith.constant 0 : index
    %22 = vector.load %arg14[%c0_20, %c0_21, %c0_22] : memref<1x1x32xbf16, #tpu.memory_space<vmem>>, vector<1x1x32xbf16>
    %23 = vector.shape_cast %22 : vector<1x1x32xbf16> to vector<1x32xbf16>
    %24 = arith.extf %23 : vector<1x32xbf16> to vector<1x32xf32>
    %cst = arith.constant dense<0.000000e+00> : vector<16xf32>
    %25 = vector.multi_reduction <add>, %3, %cst [1] : vector<16x32xf32> to vector<16xf32>
    %26 = vector.shape_cast %25 : vector<16xf32> to vector<16x1xf32>
    %cst_23 = arith.constant 3.200000e+01 : f32
    %27 = vector.broadcast %cst_23 : f32 to vector<16x1xf32>
    %28 = arith.divf %26, %27 : vector<16x1xf32>
    %29 = vector.broadcast %28 : vector<16x1xf32> to vector<16x32xf32>
    %30 = arith.subf %3, %29 : vector<16x32xf32>
    %31 = arith.mulf %30, %30 : vector<16x32xf32>
    %cst_24 = arith.constant dense<0.000000e+00> : vector<16xf32>
    %32 = vector.multi_reduction <add>, %31, %cst_24 [1] : vector<16x32xf32> to vector<16xf32>
    %33 = vector.shape_cast %32 : vector<16xf32> to vector<16x1xf32>
    %cst_25 = arith.constant 3.200000e+01 : f32
    %34 = vector.broadcast %cst_25 : f32 to vector<16x1xf32>
    %35 = arith.divf %33, %34 : vector<16x1xf32>
    %cst_26 = arith.constant 9.99999974E-6 : f32
    %36 = vector.broadcast %cst_26 : f32 to vector<16x1xf32>
    %37 = arith.addf %35, %36 : vector<16x1xf32>
    %38 = math.rsqrt %37 : vector<16x1xf32>
    %39 = vector.broadcast %38 : vector<16x1xf32> to vector<16x32xf32>
    %40 = arith.mulf %30, %39 : vector<16x32xf32>
    %41 = vector.broadcast %6 : vector<1x32xf32> to vector<16x32xf32>
    %42 = arith.mulf %40, %41 : vector<16x32xf32>
    %43 = vector.broadcast %9 : vector<1x32xf32> to vector<16x32xf32>
    %44 = arith.addf %42, %43 : vector<16x32xf32>
    %c0_27 = arith.constant 0 : index
    %c0_28 = arith.constant 0 : index
    %c0_29 = arith.constant 0 : index
    %45 = vector.load %arg5[%c0_27, %c0_28, %c0_29] : memref<1x32x96xbf16, #tpu.memory_space<vmem>>, vector<1x32x96xbf16>
    %46 = vector.shape_cast %45 : vector<1x32x96xbf16> to vector<32x96xbf16>
    %47 = arith.extf %46 : vector<32x96xbf16> to vector<32x96xf32>
    %cst_30 = arith.constant dense<0.000000e+00> : vector<16x96xf32>
    %48 = tpu.matmul %44, %47, %cst_30 {dimension_numbers = #tpu.dot_dimension_numbers<[1], [0], [0], [1], [0, 0, 1, 1], [], []>} : vector<16x32xf32>, vector<32x96xf32>, vector<16x96xf32> -> vector<16x96xf32>
    %49 = vector.broadcast %18 : vector<1x96xf32> to vector<16x96xf32>
    %50 = arith.addf %48, %49 : vector<16x96xf32>
    %51 = vector.extract_strided_slice %50 {offsets = [0, 0], sizes = [16, 32], strides = [1, 1]} : vector<16x96xf32> to vector<16x32xf32>
    %cst_31 = arith.constant 0.353553385 : f32
    %52 = vector.broadcast %cst_31 : f32 to vector<16x32xf32>
    %53 = arith.mulf %51, %52 : vector<16x32xf32>
    %54 = vector.shape_cast %53 : vector<16x32xf32> to vector<2x8x4x8xf32>
    %55 = tpu.transpose %54, [0, 2, 1, 3] : vector<2x8x4x8xf32> -> vector<2x4x8x8xf32>
    %56 = vector.shape_cast %55 : vector<2x4x8x8xf32> to vector<8x8x8xf32>
    %57 = vector.extract_strided_slice %50 {offsets = [0, 32], sizes = [16, 32], strides = [1, 1]} : vector<16x96xf32> to vector<16x32xf32>
    %58 = vector.shape_cast %57 : vector<16x32xf32> to vector<2x8x4x8xf32>
    %59 = tpu.transpose %58, [0, 2, 1, 3] : vector<2x8x4x8xf32> -> vector<2x4x8x8xf32>
    %60 = vector.shape_cast %59 : vector<2x4x8x8xf32> to vector<8x8x8xf32>
    %61 = vector.extract_strided_slice %50 {offsets = [0, 64], sizes = [16, 32], strides = [1, 1]} : vector<16x96xf32> to vector<16x32xf32>
    %62 = vector.shape_cast %61 : vector<16x32xf32> to vector<2x8x4x8xf32>
    %63 = tpu.transpose %62, [0, 2, 1, 3] : vector<2x8x4x8xf32> -> vector<2x4x8x8xf32>
    %64 = vector.shape_cast %63 : vector<2x4x8x8xf32> to vector<8x8x8xf32>
    %cst_32 = arith.constant 0xFF800000 : f32
    %65 = vector.broadcast %cst_32 : f32 to vector<8x8x1xf32>
    %cst_33 = arith.constant 0.000000e+00 : f32
    %66 = vector.broadcast %cst_33 : f32 to vector<8x8x1xf32>
    %cst_34 = arith.constant 0.000000e+00 : f32
    %67 = vector.broadcast %cst_34 : f32 to vector<8x8x8xf32>
    "tpu.trace_start"() <{level = 10 : i32, message = "bqd,bkd->bqk"}> : () -> ()
    %cst_35 = arith.constant dense<0.000000e+00> : vector<8x8x8xf32>
    %68 = tpu.matmul %56, %60, %cst_35 {dimension_numbers = #tpu.dot_dimension_numbers<[2], [2], [1], [1], [0, 0, 0, 1, 1, 1], [0], [0]>} : vector<8x8x8xf32>, vector<8x8x8xf32>, vector<8x8x8xf32> -> vector<8x8x8xf32>
    "tpu.trace_stop"() : () -> ()
    %cst_36 = arith.constant dense<0xFF800000> : vector<8x8xf32>
    %69 = vector.multi_reduction <maximumf>, %68, %cst_36 [2] : vector<8x8x8xf32> to vector<8x8xf32>
    %70 = vector.shape_cast %69 : vector<8x8xf32> to vector<8x8x1xf32>
    %71 = arith.maximumf %65, %70 : vector<8x8x1xf32>
    %72 = arith.subf %65, %71 : vector<8x8x1xf32>
    %73 = math.exp %72 : vector<8x8x1xf32>
    %74 = vector.broadcast %71 : vector<8x8x1xf32> to vector<8x8x8xf32>
    %75 = arith.subf %68, %74 : vector<8x8x8xf32>
    %76 = math.exp %75 : vector<8x8x8xf32>
    %77 = arith.mulf %73, %66 : vector<8x8x1xf32>
    %cst_37 = arith.constant dense<0.000000e+00> : vector<8x8xf32>
    %78 = vector.multi_reduction <add>, %76, %cst_37 [2] : vector<8x8x8xf32> to vector<8x8xf32>
    %79 = vector.shape_cast %78 : vector<8x8xf32> to vector<8x8x1xf32>
    %80 = arith.addf %77, %79 : vector<8x8x1xf32>
    %81 = vector.broadcast %73 : vector<8x8x1xf32> to vector<8x8x8xf32>
    %82 = arith.mulf %81, %67 : vector<8x8x8xf32>
    "tpu.trace_start"() <{level = 10 : i32, message = "bqk,bkd->bqd"}> : () -> ()
    %cst_38 = arith.constant dense<0.000000e+00> : vector<8x8x8xf32>
    %83 = tpu.matmul %76, %64, %cst_38 {dimension_numbers = #tpu.dot_dimension_numbers<[2], [1], [1], [2], [0, 0, 0, 1, 1, 2], [0], [0]>} : vector<8x8x8xf32>, vector<8x8x8xf32>, vector<8x8x8xf32> -> vector<8x8x8xf32>
    "tpu.trace_stop"() : () -> ()
    %84 = arith.addf %82, %83 : vector<8x8x8xf32>
    %85 = tpu.reciprocal %80 {approx = true} : vector<8x8x1xf32> -> vector<8x8x1xf32>
    %86 = vector.broadcast %85 : vector<8x8x1xf32> to vector<8x8x8xf32>
    %87 = arith.mulf %84, %86 : vector<8x8x8xf32>
    %88 = vector.shape_cast %87 : vector<8x8x8xf32> to vector<2x4x8x8xf32>
    %89 = tpu.transpose %88, [0, 2, 1, 3] : vector<2x4x8x8xf32> -> vector<2x8x4x8xf32>
    %90 = vector.shape_cast %89 : vector<2x8x4x8xf32> to vector<16x32xf32>
    %c0_39 = arith.constant 0 : index
    %c0_40 = arith.constant 0 : index
    %c0_41 = arith.constant 0 : index
    %91 = vector.load %arg7[%c0_39, %c0_40, %c0_41] : memref<1x32x32xbf16, #tpu.memory_space<vmem>>, vector<1x32x32xbf16>
    %92 = vector.shape_cast %91 : vector<1x32x32xbf16> to vector<32x32xbf16>
    %93 = arith.extf %92 : vector<32x32xbf16> to vector<32x32xf32>
    %cst_42 = arith.constant dense<0.000000e+00> : vector<16x32xf32>
    %94 = tpu.matmul %90, %93, %cst_42 {dimension_numbers = #tpu.dot_dimension_numbers<[1], [0], [0], [1], [0, 0, 1, 1], [], []>} : vector<16x32xf32>, vector<32x32xf32>, vector<16x32xf32> -> vector<16x32xf32>
    %95 = vector.broadcast %21 : vector<1x32xf32> to vector<16x32xf32>
    %96 = arith.addf %94, %95 : vector<16x32xf32>
    %97 = arith.addf %3, %96 : vector<16x32xf32>
    %cst_43 = arith.constant dense<0.000000e+00> : vector<16xf32>
    %98 = vector.multi_reduction <add>, %97, %cst_43 [1] : vector<16x32xf32> to vector<16xf32>
    %99 = vector.shape_cast %98 : vector<16xf32> to vector<16x1xf32>
    %cst_44 = arith.constant 3.200000e+01 : f32
    %100 = vector.broadcast %cst_44 : f32 to vector<16x1xf32>
    %101 = arith.divf %99, %100 : vector<16x1xf32>
    %102 = vector.broadcast %101 : vector<16x1xf32> to vector<16x32xf32>
    %103 = arith.subf %97, %102 : vector<16x32xf32>
    %104 = arith.mulf %103, %103 : vector<16x32xf32>
    %cst_45 = arith.constant dense<0.000000e+00> : vector<16xf32>
    %105 = vector.multi_reduction <add>, %104, %cst_45 [1] : vector<16x32xf32> to vector<16xf32>
    %106 = vector.shape_cast %105 : vector<16xf32> to vector<16x1xf32>
    %cst_46 = arith.constant 3.200000e+01 : f32
    %107 = vector.broadcast %cst_46 : f32 to vector<16x1xf32>
    %108 = arith.divf %106, %107 : vector<16x1xf32>
    %cst_47 = arith.constant 9.99999974E-6 : f32
    %109 = vector.broadcast %cst_47 : f32 to vector<16x1xf32>
    %110 = arith.addf %108, %109 : vector<16x1xf32>
    %111 = math.rsqrt %110 : vector<16x1xf32>
    %112 = vector.broadcast %111 : vector<16x1xf32> to vector<16x32xf32>
    %113 = arith.mulf %103, %112 : vector<16x32xf32>
    %114 = vector.broadcast %12 : vector<1x32xf32> to vector<16x32xf32>
    %115 = arith.mulf %113, %114 : vector<16x32xf32>
    %116 = vector.broadcast %15 : vector<1x32xf32> to vector<16x32xf32>
    %117 = arith.addf %115, %116 : vector<16x32xf32>
    %cst_48 = arith.constant 0.000000e+00 : f32
    %118 = vector.broadcast %cst_48 : f32 to vector<16x32xf32>
    %c0_49 = arith.constant 0 : index
    %c0_50 = arith.constant 0 : index
    %c0_51 = arith.constant 0 : index
    %119 = vector.load %arg11[%c0_49, %c0_50, %c0_51] : memref<1x32x64xbf16, #tpu.memory_space<vmem>>, vector<1x32x64xbf16>
    %120 = vector.shape_cast %119 : vector<1x32x64xbf16> to vector<32x64xbf16>
    %121 = arith.extf %120 : vector<32x64xbf16> to vector<32x64xf32>
    %c0_52 = arith.constant 0 : index
    %c0_53 = arith.constant 0 : index
    %c0_54 = arith.constant 0 : index
    %122 = vector.load %arg12[%c0_52, %c0_53, %c0_54] : memref<1x1x64xbf16, #tpu.memory_space<vmem>>, vector<1x1x64xbf16>
    %123 = vector.shape_cast %122 : vector<1x1x64xbf16> to vector<1x64xbf16>
    %124 = arith.extf %123 : vector<1x64xbf16> to vector<1x64xf32>
    %c0_55 = arith.constant 0 : index
    %c0_56 = arith.constant 0 : index
    %c0_57 = arith.constant 0 : index
    %125 = vector.load %arg13[%c0_55, %c0_56, %c0_57] : memref<1x64x32xbf16, #tpu.memory_space<vmem>>, vector<1x64x32xbf16>
    %126 = vector.shape_cast %125 : vector<1x64x32xbf16> to vector<64x32xbf16>
    %127 = arith.extf %126 : vector<64x32xbf16> to vector<64x32xf32>
    %cst_58 = arith.constant dense<0.000000e+00> : vector<16x64xf32>
    %128 = tpu.matmul %117, %121, %cst_58 {dimension_numbers = #tpu.dot_dimension_numbers<[1], [0], [0], [1], [0, 0, 1, 1], [], []>} : vector<16x32xf32>, vector<32x64xf32>, vector<16x64xf32> -> vector<16x64xf32>
    %129 = vector.broadcast %124 : vector<1x64xf32> to vector<16x64xf32>
    %130 = arith.addf %128, %129 : vector<16x64xf32>
    %cst_59 = arith.constant 0.000000e+00 : f32
    %131 = vector.broadcast %cst_59 : f32 to vector<16x64xf32>
    %132 = arith.maximumf %130, %131 : vector<16x64xf32>
    %cst_60 = arith.constant dense<0.000000e+00> : vector<16x32xf32>
    %133 = tpu.matmul %132, %127, %cst_60 {dimension_numbers = #tpu.dot_dimension_numbers<[1], [0], [0], [1], [0, 0, 1, 1], [], []>} : vector<16x64xf32>, vector<64x32xf32>, vector<16x32xf32> -> vector<16x32xf32>
    %134 = arith.addf %118, %133 : vector<16x32xf32>
    %135 = arith.addf %97, %134 : vector<16x32xf32>
    %136 = vector.broadcast %24 : vector<1x32xf32> to vector<16x32xf32>
    %137 = arith.addf %135, %136 : vector<16x32xf32>
    %c0_61 = arith.constant 0 : index
    %c0_62 = arith.constant 0 : index
    %138 = vector.load %arg16[%c0_61, %c0_62] : memref<16x32xf32, #tpu.memory_space<vmem>>, vector<16x32xf32>
    tpu.vector_store %arg16[%c0_61, %c0_62], %137 {strides = array<i32>} : memref<16x32xf32, #tpu.memory_space<vmem>>, vector<16x32xf32>,
    %c1_i32 = arith.constant 1 : i32
    %139 = arith.cmpi eq, %arg1, %c1_i32 : i32
    %140 = arith.extui %139 : i1 to i32
    %c0_i32_63 = arith.constant 0 : i32
    %141 = arith.cmpi ne, %140, %c0_i32_63 : i32
    scf.if %141 {
      %c0_64 = arith.constant 0 : index
      %c0_65 = arith.constant 0 : index
      %142 = vector.load %arg15[%c0_64, %c0_65] : memref<16x32xf32, #tpu.memory_space<vmem>>, vector<16x32xf32>
      tpu.vector_store %arg15[%c0_64, %c0_65], %137 {strides = array<i32>} : memref<16x32xf32, #tpu.memory_space<vmem>>, vector<16x32xf32>,
    } else {
    }
    return
  }
  func.func @transform_0(%arg0: i32, %arg1: i32) -> (i32, i32) {
    %c0_i32 = arith.constant 0 : i32
    %c0_i32_0 = arith.constant 0 : i32
    return %arg0, %c0_i32 : i32, i32
  }
  func.func @transform_1(%arg0: i32, %arg1: i32) -> (i32, i32, i32) {
    %c0_i32 = arith.constant 0 : i32
    %c0_i32_0 = arith.constant 0 : i32
    %c0_i32_1 = arith.constant 0 : i32
    return %arg1, %c0_i32, %c0_i32_0 : i32, i32, i32
  }
  func.func @transform_2(%arg0: i32, %arg1: i32) -> (i32, i32, i32) {
    %c0_i32 = arith.constant 0 : i32
    %c0_i32_0 = arith.constant 0 : i32
    %c0_i32_1 = arith.constant 0 : i32
    return %arg1, %c0_i32, %c0_i32_0 : i32, i32, i32
  }
  func.func @transform_3(%arg0: i32, %arg1: i32) -> (i32, i32, i32) {
    %c0_i32 = arith.constant 0 : i32
    %c0_i32_0 = arith.constant 0 : i32
    %c0_i32_1 = arith.constant 0 : i32
    return %arg1, %c0_i32, %c0_i32_0 : i32, i32, i32
  }
  func.func @transform_4(%arg0: i32, %arg1: i32) -> (i32, i32, i32) {
    %c0_i32 = arith.constant 0 : i32
    %c0_i32_0 = arith.constant 0 : i32
    %c0_i32_1 = arith.constant 0 : i32
    return %arg1, %c0_i32, %c0_i32_0 : i32, i32, i32
  }
  func.func @transform_5(%arg0: i32, %arg1: i32) -> (i32, i32, i32) {
    %c0_i32 = arith.constant 0 : i32
    %c0_i32_0 = arith.constant 0 : i32
    %c0_i32_1 = arith.constant 0 : i32
    return %arg1, %c0_i32, %c0_i32_0 : i32, i32, i32
  }
  func.func @transform_6(%arg0: i32, %arg1: i32) -> (i32, i32, i32) {
    %c0_i32 = arith.constant 0 : i32
    %c0_i32_0 = arith.constant 0 : i32
    %c0_i32_1 = arith.constant 0 : i32
    return %arg1, %c0_i32, %c0_i32_0 : i32, i32, i32
  }
  func.func @transform_7(%arg0: i32, %arg1: i32) -> (i32, i32, i32) {
    %c0_i32 = arith.constant 0 : i32
    %c0_i32_0 = arith.constant 0 : i32
    %c0_i32_1 = arith.constant 0 : i32
    return %arg1, %c0_i32, %c0_i32_0 : i32, i32, i32
  }
  func.func @transform_8(%arg0: i32, %arg1: i32) -> (i32, i32, i32) {
    %c0_i32 = arith.constant 0 : i32
    %c0_i32_0 = arith.constant 0 : i32
    %c0_i32_1 = arith.constant 0 : i32
    return %arg1, %c0_i32, %c0_i32_0 : i32, i32, i32
  }
  func.func @transform_9(%arg0: i32, %arg1: i32) -> (i32, i32, i32) {
    %c0_i32 = arith.constant 0 : i32
    %c0_i32_0 = arith.constant 0 : i32
    %c0_i32_1 = arith.constant 0 : i32
    return %arg1, %c0_i32, %c0_i32_0 : i32, i32, i32
  }
  func.func @transform_10(%arg0: i32, %arg1: i32) -> (i32, i32, i32) {
    %c0_i32 = arith.constant 0 : i32
    %c0_i32_0 = arith.constant 0 : i32
    %c0_i32_1 = arith.constant 0 : i32
    return %arg1, %c0_i32, %c0_i32_0 : i32, i32, i32
  }
  func.func @transform_11(%arg0: i32, %arg1: i32) -> (i32, i32, i32) {
    %c0_i32 = arith.constant 0 : i32
    %c0_i32_0 = arith.constant 0 : i32
    %c0_i32_1 = arith.constant 0 : i32
    return %arg1, %c0_i32, %c0_i32_0 : i32, i32, i32
  }
  func.func @transform_12(%arg0: i32, %arg1: i32) -> (i32, i32, i32) {
    %c0_i32 = arith.constant 0 : i32
    %c0_i32_0 = arith.constant 0 : i32
    %c0_i32_1 = arith.constant 0 : i32
    return %arg1, %c0_i32, %c0_i32_0 : i32, i32, i32
  }
  func.func @transform_13(%arg0: i32, %arg1: i32) -> (i32, i32) {
    %c0_i32 = arith.constant 0 : i32
    %c0_i32_0 = arith.constant 0 : i32
    return %arg0, %c0_i32 : i32, i32
  }
}

</mosaic_0001>

<bundles_post_ra>
// kernel: tpu_custom_call.1
= control target key start
LH: loop header
LB: loop body
LE: loop exit
PB: predicated region body
PF: predicated region fallthrough
CT: control target
= control target key end

     0   :  { %s6406_s0 = inlined_call_operand.hbm [shape: f32[16,32], index: 0, kind: input, shape index: {}]   ;;  %s6407_s1 = inlined_call_operand.hbm [shape: bf16[2,1,32], index: 1, kind: input, shape index: {}]   ;;  %s6408_s2 = inlined_call_operand.hbm [shape: bf16[2,1,32], index: 2, kind: input, shape index: {}]   ;;  %s6409_s3 = inlined_call_operand.hbm [shape: bf16[2,32,96], index: 3, kind: input, shape index: {}]   ;;  %s6410_s4 = inlined_call_operand.hbm [shape: bf16[2,1,96], index: 4, kind: input, shape index: {}]   ;;  %s6411_s5 = inlined_call_operand.hbm [shape: bf16[2,32,32], index: 5, kind: input, shape index: {}]   ;;  %s6412_s6 = inlined_call_operand.hbm [shape: bf16[2,1,32], index: 6, kind: input, shape index: {}]   ;;  %s6413_s7 = inlined_call_operand.hbm [shape: bf16[2,1,32], index: 7, kind: input, shape index: {}]   ;;  %s6414_s8 = inlined_call_operand.hbm [shape: bf16[2,1,32], index: 8, kind: input, shape index: {}]   ;;  %s6415_s9 = inlined_call_operand.hbm [shape: bf16[2,32,64], index: 9, kind: input, shape index: {}]   ;;  %s6416_s10 = inlined_call_operand.hbm [shape: bf16[2,1,64], index: 10, kind: input, shape index: {}]   ;;  %s6417_s11 = inlined_call_operand.hbm [shape: bf16[2,64,32], index: 11, kind: input, shape index: {}]   ;;  %s6418_s12 = inlined_call_operand.hbm [shape: bf16[2,1,32], index: 12, kind: input, shape index: {}]   ;;  %s6419_s13 = inlined_call_operand.hbm [shape: f32[16,32], index: 13, kind: output, shape index: {}]  }
   0x1   :  { %6441 = sst [smem:[#allocation37_spill]] %s6406_s0 }
   0x2   :  { %6442 = sst [smem:[#allocation38_spill]] %s6407_s1 }
   0x3   :  { %6443 = sst [smem:[#allocation39_spill]] %s6409_s3 }
   0x4   :  { %6444 = sst [smem:[#allocation40_spill]] %s6411_s5 }
   0x5   :  { %6445 = sst [smem:[#allocation41_spill]] %s6413_s7 }
   0x6   :  { %6446 = sst [smem:[#allocation42_spill]] %s6414_s8 }
   0x7   :  { %6447 = sst [smem:[#allocation43_spill]] %s6416_s10 }
   0x8   :  { %6448 = sst [smem:[#allocation44_spill]] %s6418_s12 }
   0x9   :  { %6449 = sst [smem:[#allocation45_spill]] %s6419_s13 }
   0xa   :  { %18 = vsyncpa [#allocation4], 0 }
   0xb   :  { %19 = vsyncpa [#allocation7], 0 }
   0xc   :  { %21 = vsyncpa [#allocation7 + $0x1], 0 }
   0xd   :  { %22 = vsyncpa [#allocation10], 0 }
   0xe   :  { %24 = vsyncpa [#allocation10 + $0x1], 0 }
   0xf   :  { %25 = vsyncpa [#allocation13], 0 }
  0x10   :  { %27 = vsyncpa [#allocation13 + $0x1], 0 }
  0x11   :  { %28 = vsyncpa [#allocation16], 0 }
  0x12   :  { %30 = vsyncpa [#allocation16 + $0x1], 0 }
  0x13   :  { %31 = vsyncpa [#allocation19], 0 }
  0x14   :  { %33 = vsyncpa [#allocation19 + $0x1], 0 }
  0x15   :  { %34 = vsyncpa [#allocation22], 0 }
  0x16   :  { %36 = vsyncpa [#allocation22 + $0x1], 0 }
  0x17   :  { %37 = vsyncpa [#allocation5], 0  ;;  %s5360_s25 = smov 0   ;;  %s5362_s26 = smov 0  }
  0x18   :  { %s5364_s27 = smov 0   ;;  %s5366_s28 = smov 0  }
  0x19   :  { %s5368_s29 = smov 0   ;;  %s5370_s30 = smov 0  }
  0x1a LB: > { %6450 = sst [smem:[#allocation33_spill]] %s5245_s27  ;;  %s52_s14 = sadd.s32 1, %s5253_s29  ;;  %s5257_s30 = sphi %s5370_s30, %s43_s30   ;;  %s5253_s29 = sphi %s5368_s29, %s6499_s29   ;;  %s5249_s28 = sphi %s5366_s28, %s6498_s28   ;;  %s5245_s27 = sphi %s5364_s27, %s6494_s27   ;;  %s5241_s26 = sphi %s5362_s26, %s6497_s26   ;;  %s5237_s25 = sphi %s5360_s25, %s6496_s25  }
  0x1b   : > { %6451 = sst [smem:[#allocation34_spill]] %s5249_s28  ;;  %s88_s15 = sadd.s32 1, %s5245_s27 }
  0x1c   : > { %p53_p0 = scmp.ge.s32.totalorder %s52_s14, 2  ;;  %p95_p1 = scmp.ne.s32.totalorder %s5245_s27, %s5241_s26 }
  0x1d   : > { %p96_p2 = scmp.eq.s32.totalorder %s5257_s30, 0  ;;  %p4636_p4 = scmp.lt.s32.totalorder %s5257_s30, 2 }
  0x1e   : > { %s6501_s14 = smov (%p53_p0, %s52_s14), 0  ;;  %s5401_s17 = sand.u32 1, %s5257_s30  }
  0x1f   : > { %6452 = sst [smem:[#allocation35_spill]] %s6501_s14  ;;  %p97_p3 = por %p96_p2, %p95_p1 }
  0x20   : > { %s85_s16 = ssub.s32 %s5253_s29, %s6501_s14  ;;  %s5404_s18 = sand.u32 1, %s5245_s27  }
  0x21   : > { %p86_p5 = scmp.eq.s32.totalorder %s85_s16, 0  ;;  %s5407_s19 = sshll.u32 %s5253_s29, 4 }
  0x22   : > { %s6454_s1 = sld [smem:[#allocation38_spill]]  ;;  %s456_s24 = scalar_lea.vmem [#allocation6], %s5404_s18 }
  0x23   : > { %s5410_s20 = scalar_select %p86_p5, %s5245_s27, %s88_s15  }
  0x24   : > { %s463_s16 = sshll.u32 %s456_s24, 4  ;;  %p5419_p6 = pnand %p4636_p4, %p97_p3  ;;  %s5423_s16 = int_to_ptr.vmem [resolvable:$true] %s463_s16 }
  0x25   : > { %6453 = sst [smem:[#allocation36_spill]] %s5410_s20  ;;  %s5426_s15 = sshll.u32 %s5404_s18, 4 }
  0x26   : > { %s6455_s14 = scalar_select %p5419_p6, 1, 0 }
  0x27   : > { %p5433_p8 = pneg %p5419_p6 }
  0x28   : > { %s5416_s23 = scalar_lea.hbm %s6454_s1, %s5407_s19  ;;  %s4770_s13 = scalar_lea.hbm %s6454_s1, 32 }
  0x29   : > { %s4765_s27 = scalar_lea.hbm %s5416_s23, 16  ;;  %p4771_p11 = scmp.lt.u32.totalorder %s5416_s23, %s6454_s1 }
  0x2a   : > { %p4766_p7 = scmp.ne.s32.totalorder %s5416_s23, %s4765_s27  ;;  %p4772_p12 = scmp.lt.u32.totalorder %s4770_s13, %s4765_s27 }
  0x2b   : > { %s6456_s21 = scalar_select %p5433_p8, 1, 0 }
  0x2c   : > { %p4768_p9 = pnand %p5433_p8, %p4766_p7  ;;  %p4773_p13 = por %p4772_p12, %p4771_p11 }
  0x2d   : > { %p4774_p0 = scmp.lt.u32.totalorder %s4765_s27, %s5416_s23 }
  0x2e   : > { %p4769_p10 = pneg %p4768_p9 }
  0x2f   : > { %p4775_p1 = por %p4774_p0, %p4773_p13 }
  0x31   : > { %p4776_p2 = pnand %p4775_p1, %p4769_p10 }
  0x33   : > { %4779 = shalt.err (!%p4776_p2)
}
  0x34   : > { %s4780_s20 = scalar_lea.vmem %s5423_s16, 16  ;;  %s5259_s22 = smov [#allocation6]  }
  0x35   : > { %p4781_p3 = scmp.ne.s32.totalorder %s5423_s16, %s4780_s20  ;;  %s4785_s24 = sshll.u32 %s5259_s22, 4  ;;  %s4786_s24 = int_to_ptr.vmem [resolvable:$false] %s4785_s24 }
  0x36   : > { %s4787_s12 = scalar_lea.vmem %s4786_s24, 32  ;;  %p4788_p7 = scmp.lt.s32.totalorder %s5423_s16, %s4786_s24 }
  0x37   : > { %p4783_p4 = pnand %p4781_p3, %p5433_p8  ;;  %p4789_p9 = scmp.lt.s32.totalorder %s4787_s12, %s4780_s20 }
  0x39   : > { %p4784_p5 = pneg %p4783_p4  ;;  %p4790_p11 = por %p4789_p9, %p4788_p7 }
  0x3b   : > { %p4791_p12 = pnand %p4790_p11, %p4784_p5 }
  0x3d   : > { %4794 = shalt.err (!%p4791_p12)
}
  0x3e   : > { %s6457_s13 = scalar_lea.sflag [#allocation7], %s5401_s17  ;;  %s5459_s27 = sshll.u32 %s5253_s29, 8 }
  0x3f   : > { %4601 = dma.hbm_to_vmem [thread:$0]  (!%p5419_p6), %s5416_s23, 16, %s5423_s16, %s6457_s13  }
  0x40   : > { %s6458_s3 = sld [smem:[#allocation39_spill]]  ;;  %s491_s24 = scalar_lea.vmem [#allocation9], %s5426_s15 }
  0x41   : > { %s498_s12 = sshll.u32 %s491_s24, 4  ;;  %s6426_s1 = scalar_lea.sflag [#allocation10], %s5401_s17  ;;  %s5468_s12 = int_to_ptr.vmem [resolvable:$true] %s498_s12 }
  0x46   : > { %s5465_s20 = scalar_lea.hbm %s6458_s3, %s5459_s27  ;;  %s4800_s13 = scalar_lea.hbm %s6458_s3, 512 }
  0x47   : > { %s4795_s10 = scalar_lea.hbm %s5465_s20, 256  ;;  %p4801_p1 = scmp.lt.u32.totalorder %s5465_s20, %s6458_s3 }
  0x48   : > { %p4796_p10 = scmp.ne.s32.totalorder %s5465_s20, %s4795_s10  ;;  %p4802_p2 = scmp.lt.u32.totalorder %s4800_s13, %s4795_s10 }
  0x49   : > { %p4804_p4 = scmp.lt.u32.totalorder %s4795_s10, %s5465_s20 }
  0x4a   : > { %p4798_p13 = pnand %p4796_p10, %p5433_p8  ;;  %p4803_p3 = por %p4802_p2, %p4801_p1 }
  0x4c   : > { %p4799_p0 = pneg %p4798_p13  ;;  %p4805_p5 = por %p4804_p4, %p4803_p3 }
  0x4e   : > { %p4806_p7 = pnand %p4805_p5, %p4799_p0 }
  0x50   : > { %4809 = shalt.err (!%p4806_p7)
}
  0x51   : > { %s4810_s24 = scalar_lea.vmem %s5468_s12, 256  ;;  %s5260_s23 = smov [#allocation9]  }
  0x52   : > { %p4811_p9 = scmp.ne.s32.totalorder %s5468_s12, %s4810_s24  ;;  %s4815_s16 = sshll.u32 %s5260_s23, 4  ;;  %s4816_s16 = int_to_ptr.vmem [resolvable:$false] %s4815_s16 }
  0x53   : > { %s4817_s28 = scalar_lea.vmem %s4816_s16, 512  ;;  %p4818_p10 = scmp.lt.s32.totalorder %s5468_s12, %s4816_s16 }
  0x54   : > { %p4813_p11 = pnand %p4811_p9, %p5433_p8  ;;  %p4819_p13 = scmp.lt.s32.totalorder %s4817_s28, %s4810_s24 }
  0x56   : > { %p4814_p12 = pneg %p4813_p11  ;;  %p4820_p1 = por %p4819_p13, %p4818_p10 }
  0x58   : > { %p4821_p2 = pnand %p4820_p1, %p4814_p12 }
  0x5a   : > { %4824 = shalt.err (!%p4821_p2)
}
  0x5b   : > { %s6428_s10 = smov 64   ;;  %s5262_s13 = smov 4  }
  0x5c   : > { %4607 = dma.hbm_to_vmem [thread:$0]  (!%p5419_p6), %s5465_s20, 256, %s5468_s12, %s6426_s1, %s6428_s10, %s6428_s10, %s5262_s13  }
  0x5d   : > { %s6459_s5 = sld [smem:[#allocation40_spill]]  ;;  %s529_s16 = scalar_lea.vmem [#allocation12], %s5426_s15 }
  0x5e   : > { %s536_s28 = sshll.u32 %s529_s16, 4  ;;  %s6427_s3 = scalar_lea.sflag [#allocation13], %s5401_s17  ;;  %s5504_s28 = int_to_ptr.vmem [resolvable:$true] %s536_s28 }
  0x63   : > { %s5501_s23 = scalar_lea.hbm %s6459_s5, %s5459_s27  ;;  %s4830_s22 = scalar_lea.hbm %s6459_s5, 512 }
  0x64   : > { %s4825_s8 = scalar_lea.hbm %s5501_s23, 256  ;;  %p4831_p5 = scmp.lt.u32.totalorder %s5501_s23, %s6459_s5 }
  0x65   : > { %p4826_p0 = scmp.ne.s32.totalorder %s5501_s23, %s4825_s8  ;;  %p4832_p7 = scmp.lt.u32.totalorder %s4830_s22, %s4825_s8 }
  0x66   : > { %p4834_p11 = scmp.lt.u32.totalorder %s4825_s8, %s5501_s23 }
  0x67   : > { %p4828_p3 = pnand %p4826_p0, %p5433_p8  ;;  %p4833_p9 = por %p4832_p7, %p4831_p5 }
  0x69   : > { %p4829_p4 = pneg %p4828_p3  ;;  %p4835_p12 = por %p4834_p11, %p4833_p9 }
  0x6b   : > { %p4836_p10 = pnand %p4835_p12, %p4829_p4 }
  0x6d   : > { %4839 = shalt.err (!%p4836_p10)
}
  0x6e   : > { %s4840_s16 = scalar_lea.vmem %s5504_s28, 256  ;;  %s5263_s20 = smov [#allocation12]  }
  0x6f   : > { %p4841_p13 = scmp.ne.s32.totalorder %s5504_s28, %s4840_s16  ;;  %s4845_s12 = sshll.u32 %s5263_s20, 4  ;;  %s4846_s12 = int_to_ptr.vmem [resolvable:$false] %s4845_s12 }
  0x70   : > { %s4847_s1 = scalar_lea.vmem %s4846_s12, 512  ;;  %p4848_p0 = scmp.lt.s32.totalorder %s5504_s28, %s4846_s12 }
  0x71   : > { %p4843_p1 = pnand %p4841_p13, %p5433_p8  ;;  %p4849_p3 = scmp.lt.s32.totalorder %s4847_s1, %s4840_s16 }
  0x73   : > { %p4844_p2 = pneg %p4843_p1  ;;  %p4850_p5 = por %p4849_p3, %p4848_p0 }
  0x75   : > { %p4851_p7 = pnand %p4850_p5, %p4844_p2 }
  0x77   : > { %4854 = shalt.err (!%p4851_p7)
}
  0x78   : > { %4613 = dma.hbm_to_vmem [thread:$0]  (!%p5419_p6), %s5501_s23, 256, %s5504_s28, %s6427_s3, %s6428_s10, %s6428_s10, %s5262_s13  }
  0x79   : > { %s6460_s7 = sld [smem:[#allocation41_spill]]  ;;  %s566_s16 = scalar_lea.vmem [#allocation15], %s5404_s18 }
  0x7a   : > { %s573_s20 = sshll.u32 %s566_s16, 4  ;;  %s6440_s12 = scalar_lea.sflag [#allocation16], %s5401_s17  ;;  %s574_s20 = int_to_ptr.vmem [resolvable:$true] %s573_s20 }
  0x7f   : > { %s5537_s24 = scalar_lea.hbm %s6460_s7, %s5407_s19  ;;  %s4860_s28 = scalar_lea.hbm %s6460_s7, 32 }
  0x80   : > { %s4855_s1 = scalar_lea.hbm %s5537_s24, 16  ;;  %p4861_p12 = scmp.lt.u32.totalorder %s5537_s24, %s6460_s7 }
  0x81   : > { %p4856_p4 = scmp.ne.s32.totalorder %s5537_s24, %s4855_s1  ;;  %p4862_p10 = scmp.lt.u32.totalorder %s4860_s28, %s4855_s1 }
  0x82   : > { %p4864_p1 = scmp.lt.u32.totalorder %s4855_s1, %s5537_s24 }
  0x83   : > { %p4858_p9 = pnand %p4856_p4, %p5433_p8  ;;  %p4863_p13 = por %p4862_p10, %p4861_p12 }
  0x85   : > { %p4859_p11 = pneg %p4858_p9  ;;  %p4865_p2 = por %p4864_p1, %p4863_p13 }
  0x87   : > { %p4866_p0 = pnand %p4865_p2, %p4859_p11 }
  0x89   : > { %4869 = shalt.err (!%p4866_p0)
}
  0x8a   : > { %s4870_s16 = scalar_lea.vmem %s574_s20, 16  ;;  %s5264_s3 = smov [#allocation15]  }
  0x8b   : > { %p4871_p3 = scmp.ne.s32.totalorder %s574_s20, %s4870_s16  ;;  %s4875_s10 = sshll.u32 %s5264_s3, 4  ;;  %s4876_s10 = int_to_ptr.vmem [resolvable:$false] %s4875_s10 }
  0x8c   : > { %s4877_s5 = scalar_lea.vmem %s4876_s10, 32  ;;  %p4878_p4 = scmp.lt.s32.totalorder %s574_s20, %s4876_s10 }
  0x8d   : > { %p4873_p5 = pnand %p4871_p3, %p5433_p8  ;;  %p4879_p9 = scmp.lt.s32.totalorder %s4877_s5, %s4870_s16 }
  0x8f   : > { %p4874_p7 = pneg %p4873_p5  ;;  %p4880_p6 = por %p4879_p9, %p4878_p4 }
  0x91   : > { %p4881_p10 = pnand %p4880_p6, %p4874_p7 }
  0x93   : > { %4884 = shalt.err (!%p4881_p10)
}
  0x94   : > { %p6461_p12 = scmp.ne.s32.totalorder %s6455_s14, 0  ;;  %s5564_s23 = scalar_lea.hbm %s6415_s9, %s5459_s27 }
  0x95   : > { %s601_s10 = scalar_lea.vmem [#allocation18], %s5426_s15  ;;  %s4216_s8 = sshll.u32 %s5404_s18, 5 }
  0x96   : > { %4619 = dma.hbm_to_vmem [thread:$0]  (!%p6461_p12), %s5537_s24, 16, %s574_s20, %s6440_s12  }
  0x97   : > { %s608_s28 = sshll.u32 %s601_s10, 4  ;;  %s6433_s22 = scalar_lea.sflag [#allocation19], %s5401_s17  ;;  %s5567_s28 = int_to_ptr.vmem [resolvable:$true] %s608_s28 }
  0x98   : > { %s4885_s16 = scalar_lea.hbm %s5564_s23, 256  ;;  %s4890_s27 = scalar_lea.hbm %s6415_s9, 512 }
  0x99   : > { %p4886_p6 = scmp.ne.s32.totalorder %s5564_s23, %s4885_s16  ;;  %p4891_p1 = scmp.lt.u32.totalorder %s5564_s23, %s6415_s9 }
  0x9a   : > { %p4892_p2 = scmp.lt.u32.totalorder %s4890_s27, %s4885_s16  ;;  %p4894_p3 = scmp.lt.u32.totalorder %s4885_s16, %s5564_s23 }
  0x9b   : > { %p4888_p11 = pnand %p4886_p6, %p5433_p8 }
  0x9c   : > { %p4893_p0 = por %p4892_p2, %p4891_p1 }
  0x9d   : > { %p4889_p13 = pneg %p4888_p11 }
  0x9e   : > { %p4895_p5 = por %p4894_p3, %p4893_p0 }
  0xa0   : > { %p4896_p7 = pnand %p4895_p5, %p4889_p13 }
  0xa2   : > { %4899 = shalt.err (!%p4896_p7)
}
  0xa3   : > { %s4900_s15 = scalar_lea.vmem %s5567_s28, 256  ;;  %s5265_s3 = smov [#allocation18]  }
  0xa4   : > { %p4901_p4 = scmp.ne.s32.totalorder %s5567_s28, %s4900_s15  ;;  %s4905_s10 = sshll.u32 %s5265_s3, 4  ;;  %s4906_s10 = int_to_ptr.vmem [resolvable:$false] %s4905_s10 }
  0xa5   : > { %s4907_s24 = scalar_lea.vmem %s4906_s10, 512  ;;  %p4908_p6 = scmp.lt.s32.totalorder %s5567_s28, %s4906_s10 }
  0xa6   : > { %p4903_p9 = pnand %p4901_p4, %p5433_p8  ;;  %p4909_p11 = scmp.lt.s32.totalorder %s4907_s24, %s4900_s15 }
  0xa8   : > { %p4904_p10 = pneg %p4903_p9  ;;  %p4910_p1 = por %p4909_p11, %p4908_p6 }
  0xaa   : > { %p4911_p2 = pnand %p4910_p1, %p4904_p10 }
  0xac   : > { %4914 = shalt.err (!%p4911_p2)
}
  0xad   : > { %s6462_s16 = smov 64   ;;  %s4283_s20 = sshll.u32 %s5253_s29, 9 }
  0xae   : > { %4625 = dma.hbm_to_vmem [thread:$0]  (!%p6461_p12), %s5564_s23, 256, %s5567_s28, %s6433_s22, %s6462_s16, %s6462_s16, %s5262_s13  }
  0xaf   : > { %s5601_s1 = scalar_lea.hbm %s6417_s11, %s4283_s20  ;;  %s639_s15 = scalar_lea.vmem [#allocation21], %s4216_s8 }
  0xb0   : > { %s646_s3 = sshll.u32 %s639_s15, 4  ;;  %s6432_s10 = scalar_lea.sflag [#allocation22], %s5401_s17  ;;  %s5605_s3 = int_to_ptr.vmem [resolvable:$true] %s646_s3 }
  0xb1   : > { %s4915_s24 = scalar_lea.hbm %s5601_s1, 512  ;;  %s4920_s20 = scalar_lea.hbm %s6417_s11, 1024 }
  0xb2   : > { %p4916_p13 = scmp.ne.s32.totalorder %s5601_s1, %s4915_s24  ;;  %p4921_p5 = scmp.lt.u32.totalorder %s5601_s1, %s6417_s11 }
  0xb3   : > { %p4922_p7 = scmp.lt.u32.totalorder %s4920_s20, %s4915_s24  ;;  %p4924_p9 = scmp.lt.u32.totalorder %s4915_s24, %s5601_s1 }
  0xb4   : > { %p4918_p0 = pnand %p4916_p13, %p5433_p8 }
  0xb5   : > { %p4923_p4 = por %p4922_p7, %p4921_p5 }
  0xb6   : > { %p4919_p3 = pneg %p4918_p0 }
  0xb7   : > { %p4925_p10 = por %p4924_p9, %p4923_p4 }
  0xb9   : > { %p4926_p6 = pnand %p4925_p10, %p4919_p3 }
  0xbb   : > { %4929 = shalt.err (!%p4926_p6)
}
  0xbc   : > { %s4930_s8 = scalar_lea.vmem %s5605_s3, 512  ;;  %s5266_s15 = smov [#allocation21]  }
  0xbd   : > { %p4931_p11 = scmp.ne.s32.totalorder %s5605_s3, %s4930_s8  ;;  %s4935_s23 = sshll.u32 %s5266_s15, 4  ;;  %s4936_s23 = int_to_ptr.vmem [resolvable:$false] %s4935_s23 }
  0xbe   : > { %s4937_s28 = scalar_lea.vmem %s4936_s23, 1024  ;;  %p4938_p13 = scmp.lt.s32.totalorder %s5605_s3, %s4936_s23 }
  0xbf   : > { %p4933_p1 = pnand %p4931_p11, %p5433_p8  ;;  %p4939_p0 = scmp.lt.s32.totalorder %s4937_s28, %s4930_s8 }
  0xc1   : > { %p4934_p2 = pneg %p4933_p1  ;;  %p4940_p5 = por %p4939_p0, %p4938_p13 }
  0xc3   : > { %p4941_p7 = pnand %p4940_p5, %p4934_p2 }
  0xc5   : > { %4944 = shalt.err (!%p4941_p7)
}
  0xc6   : > { %4631 = dma.hbm_to_vmem [thread:$0]  (!%p6461_p12), %s5601_s1, 512, %s5605_s3, %s6432_s10, %s6462_s16, %s6462_s16, %s5262_s13  }
  0xc7   : > { %s5635_s24 = sadd.s32 4294967295, %s5257_s30   ;;  %p101_p3 = scmp.ne.s32.totalorder %s5241_s26, %s5237_s25 }
  0xc8   : > { %p6434_p4 = scmp.eq.s32.totalorder %s5635_s24, 0  ;;  %p4197_p9 = scmp.ge.s32.totalorder %s5257_s30, 1 }
  0xc9   : > { %p424_p10 = scmp.lt.s32.totalorder %s5257_s30, 3  ;;  %s5267_s13 = smov [#allocation3]  }
  0xca   : > { %p5644_p6 = por %p6434_p4, %p101_p3  ;;  %s439_s16 = sshll.u32 %s5267_s13, 4  ;;  %s440_s16 = int_to_ptr.vmem [resolvable:$true] %s439_s16 }
  0xcb   : > { %p5648_p11 = pnand %p4197_p9, %p424_p10  ;;  %s5664_s5 = scalar_lea.hbm %s6408_s2, %s5407_s19 }
  0xcc   : > { %s6463_s20 = scalar_select %p5644_p6, 1, 0 }
  0xcd   : > { %s6464_s27 = scalar_select %p5648_p11, 1, 0 }
  0xce   : > { %p4594_p1 = pneg %p5648_p11  ;;  %s473_s8 = scalar_lea.vmem [#allocation8], %s5404_s18 }
  0xcf   : > { %s480_s15 = sshll.u32 %s473_s8, 4  ;;  %s6466_s0 = sld [smem:[#allocation37_spill]]  ;;  %s5667_s15 = int_to_ptr.vmem [resolvable:$true] %s480_s15 }
  0xd0   : > { %p5656_p2 = pnand %p4594_p1, %p6434_p4 }
  0xd2   : > { %p4947_p0 = pneg %p5656_p2 }
  0xd5   : > { %s4945_s13 = scalar_lea.hbm %s6466_s0, 256 }
  0xd6   : > { %p4946_p13 = scmp.ne.s32.totalorder %s6466_s0, %s4945_s13  ;;  %p4952_p3 = scmp.lt.u32.totalorder %s4945_s13, %s6466_s0 }
  0xd8   : > { %p4948_p5 = pnand %p4947_p0, %p4946_p13 }
  0xda   : > { %p4949_p7 = pneg %p4948_p5 }
  0xdc   : > { %p4954_p9 = pnand %p4952_p3, %p4949_p7 }
  0xde   : > { %4957 = shalt.err (!%p4954_p9)
}
  0xdf   : > { %s4958_s8 = scalar_lea.vmem %s440_s16, 256  ;;  %p4966_p6 = scmp.lt.s32.totalorder %s440_s16, %s440_s16 }
  0xe0   : > { %p4959_p10 = scmp.ne.s32.totalorder %s440_s16, %s4958_s8  ;;  %p4967_p11 = scmp.lt.s32.totalorder %s4958_s8, %s4958_s8 }
  0xe2   : > { %p4961_p1 = pnand %p4959_p10, %p4947_p0  ;;  %p4968_p12 = por %p4967_p11, %p4966_p6 }
  0xe4   : > { %p4962_p4 = pneg %p4961_p1 }
  0xe6   : > { %p4969_p8 = pnand %p4968_p12, %p4962_p4 }
  0xe8   : > { %4972 = shalt.err (!%p4969_p8)
}
  0xe9   : > { %s5268_s22 = smov 128   ;;  %s5269_s10 = smov 8  }
  0xea   : > { %4597 = dma.hbm_to_vmem [thread:$0]  (!%p5656_p2), %s6466_s0, 256, %s440_s16, [#allocation4], %s5268_s22, %s5268_s22, %s5269_s10  }
  0xeb   : > { %s4973_s13 = scalar_lea.hbm %s5664_s5, 16  ;;  %p6467_p0 = scmp.ne.s32.totalorder %s6456_s21, 0 }
  0xec   : > { %p4974_p13 = scmp.ne.s32.totalorder %s5664_s5, %s4973_s13  ;;  %s4978_s8 = scalar_lea.hbm %s6408_s2, 32 }
  0xed   : > { %p4979_p8 = scmp.lt.u32.totalorder %s5664_s5, %s6408_s2  ;;  %p4980_p12 = scmp.lt.u32.totalorder %s4978_s8, %s4973_s13 }
  0xee   : > { %p4976_p5 = pnand %p4974_p13, %p6467_p0  ;;  %p4982_p11 = scmp.lt.u32.totalorder %s4973_s13, %s5664_s5 }
  0xef   : > { %p4981_p4 = por %p4980_p12, %p4979_p8 }
  0xf0   : > { %p4977_p6 = pneg %p4976_p5 }
  0xf1   : > { %p4983_p7 = por %p4982_p11, %p4981_p4 }
  0xf3   : > { %p4984_p3 = pnand %p4983_p7, %p4977_p6 }
  0xf5   : > { %4987 = shalt.err (!%p4984_p3)
}
  0xf6   : > { %s4988_s16 = scalar_lea.vmem %s5667_s15, 16  ;;  %s5270_s25 = smov [#allocation8]  }
  0xf7   : > { %p4989_p2 = scmp.ne.s32.totalorder %s5667_s15, %s4988_s16  ;;  %s4993_s22 = sshll.u32 %s5270_s25, 4  ;;  %s4994_s22 = int_to_ptr.vmem [resolvable:$false] %s4993_s22 }
  0xf8   : > { %s4995_s7 = scalar_lea.vmem %s4994_s22, 32  ;;  %p4996_p1 = scmp.lt.s32.totalorder %s5667_s15, %s4994_s22 }
  0xf9   : > { %p4991_p9 = pnand %p4989_p2, %p6467_p0  ;;  %p4997_p13 = scmp.lt.s32.totalorder %s4995_s7, %s4988_s16 }
  0xfb   : > { %p4992_p10 = pneg %p4991_p9  ;;  %p4998_p5 = por %p4997_p13, %p4996_p1 }
  0xfd   : > { %p4999_p8 = pnand %p4998_p5, %p4992_p10 }
  0xff   : > { %5002 = shalt.err (!%p4999_p8)
}
 0x100   : > { %p6468_p6 = scmp.ne.s32.totalorder %s6455_s14, 0  ;;  %s6469_s12 = scalar_lea.sflag [#allocation7], %s5401_s17 }
 0x101   : > { %s5712_s28 = scalar_lea.hbm %s6410_s4, %s5407_s19  ;;  %s511_s13 = scalar_lea.vmem [#allocation11], %s5404_s18 }
 0x102   : > { %4604 = dma.hbm_to_vmem [thread:$0]  (!%p6468_p6), %s5664_s5, 16, %s5667_s15, %s6469_s12  }
 0x103   : > { %s518_s1 = sshll.u32 %s511_s13, 4  ;;  %s5003_s3 = scalar_lea.hbm %s5712_s28, 16  ;;  %s519_s1 = int_to_ptr.vmem [resolvable:$true] %s518_s1 }
 0x104   : > { %p5004_p12 = scmp.ne.s32.totalorder %s5712_s28, %s5003_s3  ;;  %s5008_s5 = scalar_lea.hbm %s6410_s4, 32 }
 0x105   : > { %p5009_p7 = scmp.lt.u32.totalorder %s5712_s28, %s6410_s4  ;;  %p5010_p3 = scmp.lt.u32.totalorder %s5008_s5, %s5003_s3 }
 0x106   : > { %p5006_p4 = pnand %p5004_p12, %p6467_p0  ;;  %p5012_p9 = scmp.lt.u32.totalorder %s5003_s3, %s5712_s28 }
 0x107   : > { %p5011_p2 = por %p5010_p3, %p5009_p7 }
 0x108   : > { %p5007_p11 = pneg %p5006_p4 }
 0x109   : > { %p5013_p10 = por %p5012_p9, %p5011_p2 }
 0x10b   : > { %p5014_p1 = pnand %p5013_p10, %p5007_p11 }
 0x10d   : > { %5017 = shalt.err (!%p5014_p1)
}
 0x10e   : > { %s5018_s22 = scalar_lea.vmem %s519_s1, 16  ;;  %s5271_s7 = smov [#allocation11]  }
 0x10f   : > { %p5019_p13 = scmp.ne.s32.totalorder %s519_s1, %s5018_s22  ;;  %s5023_s12 = sshll.u32 %s5271_s7, 4  ;;  %s5024_s12 = int_to_ptr.vmem [resolvable:$false] %s5023_s12 }
 0x110   : > { %s5025_s10 = scalar_lea.vmem %s5024_s12, 32  ;;  %p5026_p12 = scmp.lt.s32.totalorder %s519_s1, %s5024_s12 }
 0x111   : > { %p5021_p5 = pnand %p5019_p13, %p6467_p0  ;;  %p5027_p4 = scmp.lt.s32.totalorder %s5025_s10, %s5018_s22 }
 0x113   : > { %p5022_p8 = pneg %p5021_p5  ;;  %p5028_p6 = por %p5027_p4, %p5026_p12 }
 0x115   : > { %p5029_p3 = pnand %p5028_p6, %p5022_p8 }
 0x117   : > { %5032 = shalt.err (!%p5029_p3)
}
 0x118   : > { %p6470_p7 = scmp.ne.s32.totalorder %s6455_s14, 0  ;;  %s6471_s23 = scalar_lea.sflag [#allocation10], %s5401_s17 }
 0x119   : > { %s5738_s8 = scalar_lea.hbm %s6412_s6, %s5407_s19  ;;  %s549_s16 = scalar_lea.vmem [#allocation14], %s5404_s18 }
 0x11a   : > { %4610 = dma.hbm_to_vmem [thread:$0]  (!%p6470_p7), %s5712_s28, 16, %s519_s1, %s6471_s23  }
 0x11b   : > { %s556_s5 = sshll.u32 %s549_s16, 4  ;;  %s5033_s15 = scalar_lea.hbm %s5738_s8, 16  ;;  %s557_s5 = int_to_ptr.vmem [resolvable:$true] %s556_s5 }
 0x11c   : > { %p5034_p6 = scmp.ne.s32.totalorder %s5738_s8, %s5033_s15  ;;  %s5038_s28 = scalar_lea.hbm %s6412_s6, 32 }
 0x11d   : > { %p5039_p9 = scmp.lt.u32.totalorder %s5738_s8, %s6412_s6  ;;  %p5040_p10 = scmp.lt.u32.totalorder %s5038_s28, %s5033_s15 }
 0x11e   : > { %p5036_p11 = pnand %p5034_p6, %p6467_p0  ;;  %p5042_p13 = scmp.lt.u32.totalorder %s5033_s15, %s5738_s8 }
 0x11f   : > { %p5041_p1 = por %p5040_p10, %p5039_p9 }
 0x120   : > { %p5037_p2 = pneg %p5036_p11 }
 0x121   : > { %p5043_p5 = por %p5042_p13, %p5041_p1 }
 0x123   : > { %p5044_p8 = pnand %p5043_p5, %p5037_p2 }
 0x125   : > { %5047 = shalt.err (!%p5044_p8)
}
 0x126   : > { %s5048_s12 = scalar_lea.vmem %s557_s5, 16  ;;  %s5272_s10 = smov [#allocation14]  }
 0x127   : > { %p5049_p12 = scmp.ne.s32.totalorder %s557_s5, %s5048_s12  ;;  %s5053_s23 = sshll.u32 %s5272_s10, 4  ;;  %s5054_s23 = int_to_ptr.vmem [resolvable:$false] %s5053_s23 }
 0x128   : > { %s5055_s13 = scalar_lea.vmem %s5054_s23, 32  ;;  %p5056_p6 = scmp.lt.s32.totalorder %s557_s5, %s5054_s23 }
 0x129   : > { %p5051_p4 = pnand %p5049_p12, %p6467_p0  ;;  %p5057_p11 = scmp.lt.s32.totalorder %s5055_s13, %s5048_s12 }
 0x12b   : > { %p5052_p3 = pneg %p5051_p4  ;;  %p5058_p7 = por %p5057_p11, %p5056_p6 }
 0x12d   : > { %p5059_p9 = pnand %p5058_p7, %p5052_p3 }
 0x12f   : > { %5062 = shalt.err (!%p5059_p9)
}
 0x130   : > { %p6472_p10 = scmp.ne.s32.totalorder %s6455_s14, 0  ;;  %s6473_s3 = scalar_lea.sflag [#allocation13], %s5401_s17 }
 0x131   : > { %s6474_s25 = sld [smem:[#allocation42_spill]]  ;;  %s583_s1 = scalar_lea.vmem [#allocation17], %s5404_s18 }
 0x132   : > { %4616 = dma.hbm_to_vmem [thread:$0]  (!%p6472_p10), %s5738_s8, 16, %s557_s5, %s6473_s3  }
 0x133   : > { %s590_s7 = sshll.u32 %s583_s1, 4  ;;  %s591_s7 = int_to_ptr.vmem [resolvable:$true] %s590_s7 }
 0x137   : > { %s6475_s22 = smov %s6474_s25  ;;  %s5764_s28 = scalar_lea.hbm %s6474_s25, %s5407_s19 }
 0x138   : > { %s5063_s12 = scalar_lea.hbm %s5764_s28, 16  ;;  %s5068_s8 = scalar_lea.hbm %s6475_s22, 32 }
 0x139   : > { %p5064_p7 = scmp.ne.s32.totalorder %s5764_s28, %s5063_s12  ;;  %p5069_p13 = scmp.lt.u32.totalorder %s5764_s28, %s6475_s22 }
 0x13a   : > { %p5070_p5 = scmp.lt.u32.totalorder %s5068_s8, %s5063_s12  ;;  %p5072_p12 = scmp.lt.u32.totalorder %s5063_s12, %s5764_s28 }
 0x13b   : > { %p5066_p2 = pnand %p5064_p7, %p6467_p0 }
 0x13c   : > { %p5071_p8 = por %p5070_p5, %p5069_p13 }
 0x13d   : > { %p5067_p1 = pneg %p5066_p2 }
 0x13e   : > { %p5073_p4 = por %p5072_p12, %p5071_p8 }
 0x140   : > { %p5074_p3 = pnand %p5073_p4, %p5067_p1 }
 0x142   : > { %5077 = shalt.err (!%p5074_p3)
}
 0x143   : > { %s5078_s3 = scalar_lea.vmem %s591_s7, 16  ;;  %s5273_s16 = smov [#allocation17]  }
 0x144   : > { %p5079_p6 = scmp.ne.s32.totalorder %s591_s7, %s5078_s3  ;;  %s5083_s15 = sshll.u32 %s5273_s16, 4  ;;  %s5084_s15 = int_to_ptr.vmem [resolvable:$false] %s5083_s15 }
 0x145   : > { %s5085_s25 = scalar_lea.vmem %s5084_s15, 32  ;;  %p5086_p7 = scmp.lt.s32.totalorder %s591_s7, %s5084_s15 }
 0x146   : > { %p5081_p11 = pnand %p5079_p6, %p6467_p0  ;;  %p5087_p2 = scmp.lt.s32.totalorder %s5085_s25, %s5078_s3 }
 0x148   : > { %p5082_p9 = pneg %p5081_p11  ;;  %p5088_p10 = por %p5087_p2, %p5086_p7 }
 0x14a   : > { %p5089_p5 = pnand %p5088_p10, %p5082_p9 }
 0x14c   : > { %5092 = shalt.err (!%p5089_p5)
}
 0x14d   : > { %p6476_p13 = scmp.ne.s32.totalorder %s6455_s14, 0  ;;  %s6477_s1 = scalar_lea.sflag [#allocation16], %s5401_s17 }
 0x14e   : > { %s6478_s23 = sld [smem:[#allocation43_spill]]  ;;  %s621_s5 = scalar_lea.vmem [#allocation20], %s5404_s18 }
 0x14f   : > { %4622 = dma.hbm_to_vmem [thread:$0]  (!%p6476_p13), %s5764_s28, 16, %s591_s7, %s6477_s1  }
 0x150   : > { %s628_s13 = sshll.u32 %s621_s5, 4  ;;  %s629_s13 = int_to_ptr.vmem [resolvable:$true] %s628_s13 }
 0x154   : > { %s5790_s8 = scalar_lea.hbm %s6478_s23, %s5407_s19  ;;  %s5098_s28 = scalar_lea.hbm %s6478_s23, 32 }
 0x155   : > { %s5093_s3 = scalar_lea.hbm %s5790_s8, 16  ;;  %p5099_p12 = scmp.lt.u32.totalorder %s5790_s8, %s6478_s23 }
 0x156   : > { %p5094_p10 = scmp.ne.s32.totalorder %s5790_s8, %s5093_s3  ;;  %p5100_p4 = scmp.lt.u32.totalorder %s5098_s28, %s5093_s3 }
 0x157   : > { %p5102_p6 = scmp.lt.u32.totalorder %s5093_s3, %s5790_s8 }
 0x158   : > { %p5096_p1 = pnand %p5094_p10, %p6467_p0  ;;  %p5101_p3 = por %p5100_p4, %p5099_p12 }
 0x15a   : > { %p5097_p8 = pneg %p5096_p1  ;;  %p5103_p11 = por %p5102_p6, %p5101_p3 }
 0x15c   : > { %p5104_p9 = pnand %p5103_p11, %p5097_p8 }
 0x15e   : > { %5107 = shalt.err (!%p5104_p9)
}
 0x15f   : > { %s5108_s1 = scalar_lea.vmem %s629_s13, 16  ;;  %s5274_s12 = smov [#allocation20]  }
 0x160   : > { %p5109_p7 = scmp.ne.s32.totalorder %s629_s13, %s5108_s1  ;;  %s5113_s10 = sshll.u32 %s5274_s12, 4  ;;  %s5114_s10 = int_to_ptr.vmem [resolvable:$false] %s5113_s10 }
 0x161   : > { %s5115_s5 = scalar_lea.vmem %s5114_s10, 32  ;;  %p5116_p10 = scmp.lt.s32.totalorder %s629_s13, %s5114_s10 }
 0x162   : > { %p5111_p2 = pnand %p5109_p7, %p6467_p0  ;;  %p5117_p1 = scmp.lt.s32.totalorder %s5115_s5, %s5108_s1 }
 0x164   : > { %p5112_p5 = pneg %p5111_p2  ;;  %p5118_p13 = por %p5117_p1, %p5116_p10 }
 0x166   : > { %p5119_p4 = pnand %p5118_p13, %p5112_p5 }
 0x168   : > { %5122 = shalt.err (!%p5119_p4)
}
 0x169   : > { %p6479_p12 = scmp.ne.s32.totalorder %s6455_s14, 0  ;;  %s6480_s3 = scalar_lea.sflag [#allocation19], %s5401_s17 }
 0x16a   : > { %s6481_s28 = sld [smem:[#allocation44_spill]]  ;;  %s659_s1 = scalar_lea.vmem [#allocation23], %s5404_s18 }
 0x16b   : > { %4628 = dma.hbm_to_vmem [thread:$0]  (!%p6479_p12), %s5790_s8, 16, %s629_s13, %s6480_s3  }
 0x16c   : > { %s666_s12 = sshll.u32 %s659_s1, 4  ;;  %s667_s12 = int_to_ptr.vmem [resolvable:$true] %s666_s12 }
 0x170   : > { %s6482_s7 = smov %s6481_s28  ;;  %s5816_s25 = scalar_lea.hbm %s6481_s28, %s5407_s19 }
 0x171   : > { %s5123_s10 = scalar_lea.hbm %s5816_s25, 16  ;;  %s5128_s8 = scalar_lea.hbm %s6482_s7, 32 }
 0x172   : > { %p5124_p13 = scmp.ne.s32.totalorder %s5816_s25, %s5123_s10  ;;  %p5129_p6 = scmp.lt.u32.totalorder %s5816_s25, %s6482_s7 }
 0x173   : > { %p5130_p11 = scmp.lt.u32.totalorder %s5128_s8, %s5123_s10  ;;  %p5132_p7 = scmp.lt.u32.totalorder %s5123_s10, %s5816_s25 }
 0x174   : > { %p5126_p8 = pnand %p5124_p13, %p6467_p0 }
 0x175   : > { %p5131_p9 = por %p5130_p11, %p5129_p6 }
 0x176   : > { %p5127_p3 = pneg %p5126_p8 }
 0x177   : > { %p5133_p2 = por %p5132_p7, %p5131_p9 }
 0x179   : > { %p5134_p5 = pnand %p5133_p2, %p5127_p3 }
 0x17b   : > { %5137 = shalt.err (!%p5134_p5)
}
 0x17c   : > { %s5138_s18 = scalar_lea.vmem %s667_s12, 16  ;;  %s5275_s19 = smov [#allocation23]  }
 0x17d   : > { %p5139_p10 = scmp.ne.s32.totalorder %s667_s12, %s5138_s18  ;;  %s5143_s16 = sshll.u32 %s5275_s19, 4  ;;  %s5144_s16 = int_to_ptr.vmem [resolvable:$false] %s5143_s16 }
 0x17e   : > { %s5145_s0 = scalar_lea.vmem %s5144_s16, 32  ;;  %p5146_p13 = scmp.lt.s32.totalorder %s667_s12, %s5144_s16 }
 0x17f   : > { %p5141_p1 = pnand %p5139_p10, %p6467_p0  ;;  %p5147_p8 = scmp.lt.s32.totalorder %s5145_s0, %s5138_s18 }
 0x181   : > { %p5142_p4 = pneg %p5141_p1  ;;  %p5148_p12 = por %p5147_p8, %p5146_p13 }
 0x183   : > { %p5149_p6 = pnand %p5148_p12, %p5142_p4 }
 0x185   : > { %5152 = shalt.err (!%p5149_p6)
}
 0x186   : > { %p6483_p11 = scmp.ne.s32.totalorder %s6455_s14, 0  ;;  %s6484_s15 = scalar_lea.sflag [#allocation22], %s5401_s17 }
 0x187   : > { %p6485_p3 = scmp.ne.s32.totalorder %s6464_s27, 0 }
 0x188   : > { %4634 = dma.hbm_to_vmem [thread:$0]  (!%p6483_p11), %s5816_s25, 16, %s667_s12, %s6484_s15  }
 0x189   : > { %675 = sbr.rel (%p6485_p3) target bundleno = 2993 (0xbb1), region = 72  ;;  %p6486_p0 = scmp.eq.s32.totalorder (!%p6485_p3), %s5635_s24, 0 }
 0x190   : > { %5204 = dma.done.wait (%p6486_p0), [#allocation4], 256   ;;  %p6487_p9 = pmov %p6486_p0 }
 0x191   : > { %s5845_s21 = sand.u32 1, %s5635_s24   ;;  %s5848_s14 = sand.u32 1, %s5241_s26  }
 0x192   : > { %5206 = vsyncadd (%p6487_p9), [#allocation4], 4294967040  ;;  %s682_s17 = scalar_lea.sflag [#allocation7], %s5845_s21  ;;  %s684_s28 = scalar_lea.vmem [#allocation6], %s5848_s14 }
 0x193   : > { %p6488_p12 = scmp.ne.s32.totalorder %s6463_s20, 0 }
 0x195   : > { %5208 = dma.done.wait (%p6488_p12), %s682_s17, 32  }
 0x196   : > { %5210 = vsyncadd (%p6488_p12), %s682_s17, 4294967264  ;;  %s5857_s27 = sshll.u32 %s5848_s14, 4  ;;  %s692_s25 = scalar_lea.vmem [#allocation8], %s5848_s14 }
 0x197   : > { %s698_s1 = scalar_lea.sflag [#allocation10], %s5845_s21  ;;  %s701_s12 = scalar_lea.vmem [#allocation9], %s5857_s27 }
 0x198   : > { %5212 = dma.done.wait (%p6488_p12), %s698_s1, 272  }
 0x199   : > { %5214 = vsyncadd (%p6488_p12), %s698_s1, 4294967024  ;;  %s709_s10 = scalar_lea.vmem [#allocation11], %s5848_s14  ;;  %s715_s5 = scalar_lea.sflag [#allocation13], %s5845_s21 }
 0x19a   : > { %s718_s8 = scalar_lea.vmem [#allocation12], %s5857_s27 }
 0x19b   : > { %5216 = dma.done.wait (%p6488_p12), %s715_s5, 272  }
 0x19c   : > { %5218 = vsyncadd (%p6488_p12), %s715_s5, 4294967024  ;;  %s726_s13 = scalar_lea.vmem [#allocation14], %s5848_s14  ;;  %s732_s3 = scalar_lea.sflag [#allocation16], %s5845_s21 }
 0x19d   : > { %s734_s18 = scalar_lea.vmem [#allocation15], %s5848_s14 }
 0x19e   : > { %5220 = dma.done.wait (%p6488_p12), %s732_s3, 32  }
 0x19f   : > { %5222 = vsyncadd (%p6488_p12), %s732_s3, 4294967264  ;;  %s748_s16 = scalar_lea.sflag [#allocation19], %s5845_s21  ;;  %s751_s0 = scalar_lea.vmem [#allocation18], %s5857_s27 }
 0x1a0   : > { %5224 = dma.done.wait (%p6488_p12), %s748_s16, 272  }
 0x1a1   : > { %5226 = vsyncadd (%p6488_p12), %s748_s16, 4294967024  ;;  %s4225_s15 = sshll.u32 %s5848_s14, 5  ;;  %s759_s17 = scalar_lea.vmem [#allocation20], %s5848_s14 }
 0x1a2   : > { %s765_s1 = scalar_lea.sflag [#allocation22], %s5845_s21  ;;  %s5890_s5 = scalar_lea.vmem [#allocation21], %s4225_s15 }
 0x1a3   : > { %5228 = dma.done.wait (%p6488_p12), %s765_s1, 528  }
 0x1a4   : > { %5230 = vsyncadd (%p6488_p12), %s765_s1, 4294966768  ;;  %s776_s3 = scalar_lea.vmem [#allocation23], %s5848_s14  ;;  %s6489_s19 = sld [smem:[#allocation34_spill]] }
 0x1aa   : > { %p4226_p7 = scmp.ne.s32.totalorder %s6489_s19, 0 }
 0x1ab   : > { %v867_v0 = vld [vmem:[#allocation3] sm:$0xff] (!%p4226_p7)  ;;  %vm869_vm0 = vcmask (!%p4226_p7), 261120   ;;  %v868_v1 = vld [vmem:[#allocation3 + $0x8] sm:$0xff] (!%p4226_p7) }
 0x1ac   : > { %866 = sbr.rel (%p4226_p7) target bundleno = 435 (0x1b3), region = 128  ;;  %870 = vst.msk [vmem:[#allocation2] sm:$0xff] (!%p4226_p7), %vm869_vm0, %v867_v0  ;;  %871 = vst.msk [vmem:[#allocation2 + $0x8] sm:$0xff] (!%p4226_p7), %vm869_vm0, %v868_v1 }
 0x1b3 PF: > { %v872_v2 = vld [vmem:[#allocation2] sm:$0xff]  ;;  %vm888_vm1 = vcmask 261120   ;;  %v873_v3 = vld [vmem:[#allocation2 + $0x8] sm:$0xff]  ;;  %v916_v20 = vlaneseq  ;;  %s5276_s20 = smov 112   ;;  %s5277_s21 = smov 120   ;;  %v5280_v55 = vmov 0.0  }
 0x1b4   : > { %v889_v4 = vsel %vm888_vm1, %v872_v2, 0.0  ;;  %v892_v5 = vsel %vm888_vm1, %v873_v3, 0.0  ;;  %v4285_v16 = vld [vmem:[%s701_s12] sm:$0xff]   ;;  %v4324_v17 = vld [vmem:[%s701_s12 + $0x8] sm:$0xff]   ;;  %4411 = vmatprep.subr.mxu0 %v5280_v55  ;;  %s5281_s12 = smov 64   ;;  %vm5282_vm2 = vmmov 0  }
 0x1b5   : > { %890 = vadd.xlane.f32.xlu0 %v889_v4  ;;  %4523 = vmatprep.subr.bf16.mxu1 %v4285_v16  ;;  %v5906_v24 = vshrl.u32 %v916_v20, 7  ;;  %v874_v26 = vld [vmem:[%s684_s28] sm:$0x1]  ;;  %s5278_s28 = smov 104   ;;  %v5283_v58 = vmov 1983009808  }
 0x1b6   : > { %4525 = vmatpush3.bf16.msra.mxu1 %v4285_v16  ;;  %v876_v27 = vld [vmem:[%s692_s25] sm:$0x1]  ;;  %v875_v28 = vunpack.c.l.bf16 %v874_v26  ;;  %s5279_s25 = smov 96   ;;  %4413 = vmatprep.mubr.msk.f32.mxu0 %vm5282_vm2, %v5280_v55  ;;  %v1046_v59 = vunpack.c.l.s4 %v5283_v58  ;;  %v5284_v62 = vmov 1934713408   ;;  %vm1921_vm3 = vcmask 64512  }
 0x1b7   : > { %4527 = vmatprep.subr.bf16.mxu1 %v4324_v17  ;;  %v5913_v29 = vsub.s32 0, %v5906_v24  ;;  %v877_v30 = vunpack.c.l.bf16 %v876_v27  ;;  %v882_v41 = vld [vmem:[%s709_s10] sm:$0x1]  ;;  %v1078_v63 = vunpack.c.l.s4 %v5284_v62  ;;  %s5285_s10 = smov 16   ;;  %s5286_s19 = smov 8   ;;  %vm3548_vm4 = vcmask 130048  }
 0x1b8   : > { %v883_v42 = vunpack.c.l.bf16 %v882_v41  ;;  %v1047_v0 = vunpack.c.0.s8 %v1046_v59  ;;  %s5287_s16 = smov 24   ;;  %vm3551_vm5 = vcmask 195584   ;;  %s6490_s27 = scalar_lea.vmem [#allocation17], %s5848_s14  ;;  %vm3800_vm6 = vcmask 523264  }
 0x1b9   : > { %893 = vadd.xlane.f32.xlu0 %v892_v5  ;;  %v919_v31 = vrot.slane %v875_v28, %v5913_v29  ;;  %v925_v34 = vrot.slane %v877_v30, %v5913_v29 }
 0x1ba   : > { %4529 = vmatpush3.bf16.msra.mxu1 %v4324_v17  ;;  %v939_v43 = vrot.slane %v883_v42, %v5913_v29 }
 0x1bb   : > { %4401 = vmatprep.subr.mxu1 %v5280_v55 }
 0x242   : > { %v891_v6 = vpop.xlane.xlu0 %890 }
 0x243   : > { %v896_v7 = vmul.f32 0.03125, %v891_v6  ;;  %v5963_v6 = vsub.s32 %v1047_v0, %v5906_v24 }
 0x245   : > { %v898_v8 = vsub.f32 %v872_v2, %v896_v7 }
 0x246   : > { %v894_v9 = vpop.xlane.xlu0 %893 }
 0x247   : > { %v897_v10 = vmul.f32 0.03125, %v894_v9  ;;  %v900_v11 = vmul.f32 %v898_v8, %v898_v8 }
 0x249   : > { %v899_v12 = vsub.f32 %v873_v3, %v897_v10  ;;  %v902_v13 = vsel %vm888_vm1, %v900_v11, 0.0  ;;  %v1079_v3 = vunpack.c.0.s8 %v1078_v63 }
 0x24a   : > { %903 = vadd.xlane.f32.xlu1 %v902_v13 }
 0x24b   : > { %v901_v14 = vmul.f32 %v899_v12, %v899_v12 }
 0x24d   : > { %v905_v15 = vsel %vm888_vm1, %v901_v14, 0.0 }
 0x24e   : > { %906 = vadd.xlane.f32.xlu1 %v905_v15  ;;  %v5968_v15 = vsub.s32 %v1079_v3, %v5906_v24 }
 0x2d7   : > { %v904_v18 = vpop.xlane.xlu1 %903 }
 0x2d8   : > { %v908_v19 = vmul.f32 0.03125, %v904_v18 }
 0x2da   : > { %v910_v21 = vadd.f32 1e-05, %v908_v19 }
 0x2db   : > { %v907_v22 = vpop.xlane.xlu1 %906 }
 0x2dc   : > { %4707 = vrsqrt.f32 %v910_v21  ;;  %v909_v23 = vmul.f32 0.03125, %v907_v22 }
 0x2de   : > { %v911_v25 = vadd.f32 1e-05, %v909_v23 }
 0x2e0   : > { %4709 = vrsqrt.f32 %v911_v25 }
 0x2e6   : > { %v4708_v32 = vpop.eup %4707 }
 0x2e7   : > { %v914_v33 = vmul.f32 %v4708_v32, %v898_v8 }
 0x2e9   : > { %v920_v35 = vmul.f32 %v919_v31, %v914_v33 }
 0x2ea   : > { %v4710_v36 = vpop.eup %4709 }
 0x2eb   : > { %v915_v37 = vmul.f32 %v4710_v36, %v899_v12  ;;  %v926_v38 = vadd.f32 %v925_v34, %v920_v35 }
 0x2ed   : > { %v921_v39 = vmul.f32 %v919_v31, %v915_v37  ;;  %4398 = vmatprep.mubr.msk.f32.mxu1 %vm888_vm1, %v926_v38 }
 0x2ef   : > { %v927_v40 = vadd.f32 %v925_v34, %v921_v39 }
 0x2f1   : > { %4399 = vmatmul.mubr.msk.f32.vlgmr.msra.gmra.mrb[0].mxu1 %vm888_vm1, %v927_v40 }
 0x2f2   : > { %4403 = vmatprep.mubr.msk.f32.mxu1 %vm5282_vm2, %v5280_v55 }
 0x3c4   : > { %v4400_v44 = vpop.f32.mrb[0].mxu1 }
 0x3c5   : > { %v1012_v45 = vpop.f32.mrb[1].mxu1  ;;  %v1018_v47 = vadd.f32 %v4400_v44, %v939_v43 }
 0x3c6   : > { %v1013_v46 = vadd.f32 %v1012_v45, %v939_v43 }
 0x3c7   : > { %v5944_v56 = vmul.f32 0.35355338, %v1018_v47 }
 0x3c8   : > { %1321 = vrot.lane.b32.xlu1 %v1013_v46, %s5276_s20  ;;  %1317 = vrot.lane.b32.xlu0 %v1013_v46, %s5277_s21  ;;  %v5927_v48 = vmul.f32 0.35355338, %v1013_v46 }
 0x3cc   : > { %1325 = vrot.lane.b32.xlu1 %v1013_v46, %s5278_s28  ;;  %1323 = vrot.lane.b32.xlu0 %v1018_v47, %s5276_s20 }
 0x3d0   : > { %1319 = vrot.lane.b32.xlu1 %v1018_v47, %s5277_s21  ;;  %1329 = vrot.lane.b32.xlu0 %v1013_v46, %s5279_s25 }
 0x3d4   : > { %1327 = vrot.lane.b32.xlu1 %v1018_v47, %s5278_s28  ;;  %1025 = vrot.lane.b32.xlu0 %v5927_v48, %s5277_s21 }
 0x3d8   : > { %1031 = vrot.lane.b32.xlu1 %v5927_v48, %s5276_s20 }
 0x43a   : > { %v1322_v49 = vpop.permute.xlu1 %1321  ;;  %v1318_v50 = vpop.permute.xlu0 %1317 }
 0x43b   : > { %1333 = vrot.lane.b32.xlu1 %v1318_v50, %s5279_s25  ;;  %1337 = vrot.lane.b32.xlu0 %v1322_v49, %s5279_s25 }
 0x43e   : > { %v1326_v51 = vpop.permute.xlu1 %1325  ;;  %v5936_v53 = vpop.permute.xlu0 %1323 }
 0x43f   : > { %1341 = vrot.lane.b32.xlu1 %v1326_v51, %s5279_s25  ;;  %1037 = vrot.lane.b32.xlu0 %v5927_v48, %s5278_s28 }
 0x442   : > { %v1320_v52 = vpop.permute.xlu1 %1319  ;;  %v1330_v57 = vpop.permute.xlu0 %1329 }
 0x443   : > { %1331 = vrot.lane.b32.xlu1 %v1018_v47, %s5279_s25  ;;  %1335 = vrot.lane.b32.xlu0 %v1320_v52, %s5279_s25 }
 0x446   : > { %v5938_v54 = vpop.permute.xlu1 %1327  ;;  %v1026_v60 = vpop.permute.xlu0 %1025 }
 0x447   : > { %1339 = vrot.lane.b32.xlu1 %v5936_v53, %s5279_s25  ;;  %1343 = vrot.lane.b32.xlu0 %v5938_v54, %s5279_s25 }
 0x44a   : > { %v1032_v61 = vpop.permute.xlu1 %1031 }
 0x44b   : > { %1027 = vrot.lane.b32.xlu1 %v5944_v56, %s5277_s21  ;;  %1033 = vrot.lane.b32.xlu0 %v5944_v56, %s5276_s20  ;;  %v1043_v7 = vcombine.low %v5927_v48, %v1032_v61  ;;  %v1044_v8 = vcombine.high %v5927_v48, %v1032_v61 }
 0x44d   : > { %v1051_v22 = vrot.slane %v1043_v7, %v5963_v6  ;;  %v1058_v23 = vrot.slane %v1044_v8, %v5963_v6 }
 0x44f   : > { %1039 = vrot.lane.b32.xlu1 %v5944_v56, %s5278_s28  ;;  %1625 = vrot.lane.b32.xlu0 %v1013_v46, %s5281_s12 }
 0x453   : > { %1631 = vrot.lane.b32.xlu1 %v1320_v52, %s5281_s12  ;;  %1627 = vrot.lane.b32.xlu0 %v1018_v47, %s5281_s12 }
 0x457   : > { %1629 = vrot.lane.b32.xlu1 %v1318_v50, %s5281_s12 }
 0x45b   : > { %1633 = vrot.lane.b32.xlu1 %v1322_v49, %s5281_s12 }
 0x45f   : > { %1637 = vrot.lane.b32.xlu1 %v1326_v51, %s5281_s12 }
 0x4ad   : > { %v1334_v1 = vpop.permute.xlu1 %1333  ;;  %v1338_v2 = vpop.permute.xlu0 %1337 }
 0x4ae   : > { %v1353_v4 = vcombine.low %v1330_v57, %v1338_v2  ;;  %v1354_v5 = vcombine.high %v1330_v57, %v1338_v2 }
 0x4b0   : > { %v1361_v16 = vrot.slane %v1353_v4, %v5963_v6  ;;  %v1368_v17 = vrot.slane %v1354_v5, %v5963_v6 }
 0x4b1   : > { %v1342_v9 = vpop.permute.xlu1 %1341  ;;  %v1038_v10 = vpop.permute.xlu0 %1037 }
 0x4b2   : > { %v1369_v11 = vcombine.low %v1334_v1, %v1342_v9  ;;  %v1370_v12 = vcombine.high %v1334_v1, %v1342_v9  ;;  %v1059_v13 = vcombine.low %v1026_v60, %v1038_v10  ;;  %v1060_v14 = vcombine.high %v1026_v60, %v1038_v10 }
 0x4b4   : > { %v1377_v18 = vrot.slane %v1369_v11, %v5963_v6  ;;  %v1384_v19 = vrot.slane %v1370_v12, %v5963_v6  ;;  %v1067_v20 = vrot.slane %v1059_v13, %v5963_v6  ;;  %v1074_v21 = vrot.slane %v1060_v14, %v5963_v6 }
 0x4b5   : > { %v1332_v25 = vpop.permute.xlu1 %1331  ;;  %v1336_v26 = vpop.permute.xlu0 %1335 }
 0x4b6   : > { %v1385_v24 = vcombine.low %v1361_v16, %v1377_v18  ;;  %v1386_v27 = vcombine.high %v1361_v16, %v1377_v18  ;;  %v1401_v28 = vcombine.low %v1368_v17, %v1384_v19  ;;  %v1402_v30 = vcombine.high %v1368_v17, %v1384_v19 }
 0x4b7   : > { %v1075_v31 = vcombine.low %v1051_v22, %v1067_v20  ;;  %v1076_v32 = vcombine.high %v1051_v22, %v1067_v20  ;;  %v1091_v33 = vcombine.low %v1058_v23, %v1074_v21  ;;  %v1092_v34 = vcombine.high %v1058_v23, %v1074_v21 }
 0x4b8   : > { %v1393_v35 = vrot.slane %v1385_v24, %v5968_v15  ;;  %v1400_v36 = vrot.slane %v1386_v27, %v5968_v15  ;;  %v1409_v37 = vrot.slane %v1401_v28, %v5968_v15  ;;  %v1416_v38 = vrot.slane %v1402_v30, %v5968_v15 }
 0x4b9   : > { %v1083_v39 = vrot.slane %v1075_v31, %v5968_v15  ;;  %v1090_v40 = vrot.slane %v1076_v32, %v5968_v15  ;;  %v1099_v41 = vrot.slane %v1091_v33, %v5968_v15  ;;  %v1106_v42 = vrot.slane %v1092_v34, %v5968_v15  ;;  %v1340_v43 = vpop.permute.xlu1 %1339  ;;  %v1344_v44 = vpop.permute.xlu0 %1343 }
 0x4ba   : > { %v1489_v45 = vcombine.low %v1393_v35, %v1400_v36  ;;  %v4233_v46 = vcombine.high %v1393_v35, %v1400_v36  ;;  %v1505_v47 = vcombine.low %v1409_v37, %v1416_v38  ;;  %v4234_v48 = vcombine.high %v1409_v37, %v1416_v38 }
 0x4bb   : > { %v1179_v49 = vcombine.low %v1083_v39, %v1090_v40  ;;  %v4229_v50 = vcombine.high %v1083_v39, %v1090_v40  ;;  %v1195_v51 = vcombine.low %v1099_v41, %v1106_v42  ;;  %v4230_v52 = vcombine.high %v1099_v41, %v1106_v42 }
 0x4bc   : > { %v5987_v57 = vrot.slane %v1489_v45, %v5963_v6  ;;  %v5990_v58 = vrot.slane %v4233_v46, %v5963_v6  ;;  %v5993_v59 = vrot.slane %v1505_v47, %v5963_v6  ;;  %v5996_v60 = vrot.slane %v4234_v48, %v5963_v6 }
 0x4bd   : > { %v5999_v61 = vrot.slane %v1179_v49, %v5963_v6  ;;  %v6002_v62 = vrot.slane %v4229_v50, %v5963_v6  ;;  %v6005_v63 = vrot.slane %v1195_v51, %v5963_v6  ;;  %v6008_v0 = vrot.slane %v4230_v52, %v5963_v6  ;;  %v1028_v1 = vpop.permute.xlu1 %1027  ;;  %v1034_v2 = vpop.permute.xlu0 %1033 }
 0x4be   : > { %v1521_v3 = vcombine.low %v5987_v57, %v5990_v58  ;;  %v1537_v4 = vcombine.low %v5993_v59, %v5996_v60  ;;  %v1421_v5 = vcombine.low %v1332_v25, %v1340_v43  ;;  %v1422_v7 = vcombine.high %v1332_v25, %v1340_v43 }
 0x4bf   : > { %v1211_v8 = vcombine.low %v5999_v61, %v6002_v62  ;;  %v1227_v9 = vcombine.low %v6005_v63, %v6008_v0  ;;  %v1437_v10 = vcombine.low %v1336_v26, %v1344_v44  ;;  %v1438_v11 = vcombine.high %v1336_v26, %v1344_v44 }
 0x4c0   : > { %v1429_v12 = vrot.slane %v1421_v5, %v5963_v6  ;;  %v1436_v13 = vrot.slane %v1422_v7, %v5963_v6  ;;  %v1111_v14 = vcombine.low %v5944_v56, %v1034_v2  ;;  %v1112_v16 = vcombine.high %v5944_v56, %v1034_v2 }
 0x4c1   : > { %v1445_v17 = vrot.slane %v1437_v10, %v5963_v6  ;;  %v1452_v18 = vrot.slane %v1438_v11, %v5963_v6  ;;  %v1040_v19 = vpop.permute.xlu1 %1039  ;;  %v6025_v20 = vrot.slane %v1521_v3, %v5968_v15  ;;  %v6028_v21 = vrot.slane %v1537_v4, %v5968_v15 }
 0x4c2   : > { %v1119_v22 = vrot.slane %v1111_v14, %v5963_v6  ;;  %v1126_v23 = vrot.slane %v1112_v16, %v5963_v6  ;;  %v1127_v25 = vcombine.low %v1028_v1, %v1040_v19  ;;  %v1128_v26 = vcombine.high %v1028_v1, %v1040_v19 }
 0x4c3   : > { %v1453_v24 = vcombine.low %v1429_v12, %v1445_v17  ;;  %v1454_v27 = vcombine.high %v1429_v12, %v1445_v17  ;;  %v1469_v56 = vcombine.low %v1436_v13, %v1452_v18  ;;  %v1470_v28 = vcombine.high %v1436_v13, %v1452_v18 }
 0x4c4   : > { %v1135_v30 = vrot.slane %v1127_v25, %v5963_v6  ;;  %v1142_v31 = vrot.slane %v1128_v26, %v5963_v6  ;;  %v1553_v32 = vcombine.low %v6025_v20, %v6028_v21  ;;  %v1522_v33 = vcombine.high %v5987_v57, %v5990_v58 }
 0x4c5   : > { %v1461_v34 = vrot.slane %v1453_v24, %v5968_v15  ;;  %v1468_v35 = vrot.slane %v1454_v27, %v5968_v15  ;;  %v1477_v36 = vrot.slane %v1469_v56, %v5968_v15  ;;  %v1484_v37 = vrot.slane %v1470_v28, %v5968_v15  ;;  %v6042_v38 = vpop.permute.xlu1 %1631 }
 0x4c6   : > { %v1143_v39 = vcombine.low %v1119_v22, %v1135_v30  ;;  %v1144_v40 = vcombine.high %v1119_v22, %v1135_v30  ;;  %v1159_v41 = vcombine.low %v1126_v23, %v1142_v31  ;;  %v1160_v42 = vcombine.high %v1126_v23, %v1142_v31  ;;  %4402 = vmatpush3.xpose.msk.msra.mxu1 %vm1921_vm3, %v1553_v32  ;;  %v1626_v30 = vpop.permute.xlu0 %1625 }
 0x4c7   : > { %v1557_v43 = vcombine.low %v1461_v34, %v1468_v35  ;;  %v4235_v44 = vcombine.high %v1461_v34, %v1468_v35  ;;  %v1573_v45 = vcombine.low %v1477_v36, %v1484_v37  ;;  %v4236_v46 = vcombine.high %v1477_v36, %v1484_v37  ;;  %4406 = vmatprep.subr.mxu1 %v5280_v55 }
 0x4c8   : > { %v1151_v47 = vrot.slane %v1143_v39, %v5968_v15  ;;  %v1158_v48 = vrot.slane %v1144_v40, %v5968_v15  ;;  %v1167_v49 = vrot.slane %v1159_v41, %v5968_v15  ;;  %v1174_v50 = vrot.slane %v1160_v42, %v5968_v15 }
 0x4c9   : > { %v6051_v51 = vrot.slane %v1557_v43, %v5963_v6  ;;  %v6054_v52 = vrot.slane %v4235_v44, %v5963_v6  ;;  %v6057_v57 = vrot.slane %v1573_v45, %v5963_v6  ;;  %v6060_v58 = vrot.slane %v4236_v46, %v5963_v6  ;;  %v1630_v1 = vpop.permute.xlu1 %1629 }
 0x4ca   : > { %v1247_v2 = vcombine.low %v1151_v47, %v1158_v48  ;;  %v4231_v3 = vcombine.high %v1151_v47, %v1158_v48  ;;  %v1263_v4 = vcombine.low %v1167_v49, %v1174_v50  ;;  %v4232_v5 = vcombine.high %v1167_v49, %v1174_v50 }
 0x4cb   : > { %v1589_v7 = vcombine.low %v6051_v51, %v6054_v52  ;;  %v1605_v10 = vcombine.low %v6057_v57, %v6060_v58  ;;  %v1536_v16 = vrot.slane %v1522_v33, %v5968_v15  ;;  %v1538_v17 = vcombine.high %v5993_v59, %v5996_v60 }
 0x4cc   : > { %v6067_v11 = vrot.slane %v1247_v2, %v5963_v6  ;;  %v6070_v12 = vrot.slane %v4231_v3, %v5963_v6  ;;  %v6073_v13 = vrot.slane %v1263_v4, %v5963_v6  ;;  %v6076_v14 = vrot.slane %v4232_v5, %v5963_v6 }
 0x4cd   : > { %v1219_v18 = vrot.slane %v1211_v8, %v5968_v15  ;;  %v1235_v19 = vrot.slane %v1227_v9, %v5968_v15  ;;  %v1634_v22 = vpop.permute.xlu1 %1633  ;;  %v1590_v23 = vcombine.high %v6051_v51, %v6054_v52  ;;  %v1606_v25 = vcombine.high %v6057_v57, %v6060_v58 }
 0x4ce   : > { %v1552_v26 = vrot.slane %v1538_v17, %v5968_v15  ;;  %v1212_v27 = vcombine.high %v5999_v61, %v6002_v62  ;;  %v1228_v59 = vcombine.high %v6005_v63, %v6008_v0  ;;  %v1279_v60 = vcombine.low %v6067_v11, %v6070_v12 }
 0x4cf   : > { %v1243_v24 = vcombine.low %v1219_v18, %v1235_v19  ;;  %v1554_v8 = vcombine.high %v6025_v20, %v6028_v21  ;;  %v1597_v9 = vrot.slane %v1589_v7, %v5968_v15  ;;  %v1613_v56 = vrot.slane %v1605_v10, %v5968_v15 }
 0x4d0   : > { %v1295_v28 = vcombine.low %v6073_v13, %v6076_v14  ;;  %v1555_v31 = vcombine.low %v1536_v16, %v1552_v26  ;;  %v1226_v61 = vrot.slane %v1212_v27, %v5968_v15  ;;  %v1242_v62 = vrot.slane %v1228_v59, %v5968_v15 }
 0x4d1   : > { %4404 = vmatmul.mubr.msk.f32.vlgmr.msra.gmra.mrb[2].mxu1 %vm1921_vm3, %v1243_v24  ;;  %v1638_v63 = vpop.permute.xlu1 %1637  ;;  %v1280_v0 = vcombine.high %v6067_v11, %v6070_v12  ;;  %v1649_v20 = vcombine.low %v1626_v30, %v1634_v22  ;;  %v1650_v21 = vcombine.high %v1626_v30, %v1634_v22  ;;  %v1296_v32 = vcombine.high %v6073_v13, %v6076_v14 }
 0x4d2   : > { %4407 = vmatpush3.xpose.msk.msra.mxu1 %vm1921_vm3, %v1554_v8  ;;  %4408 = vmatprep.mubr.msk.f32.mxu1 %vm5282_vm2, %v5280_v55  ;;  %v1244_v33 = vcombine.high %v1219_v18, %v1235_v19  ;;  %v1621_v34 = vcombine.low %v1597_v9, %v1613_v56  ;;  %v1556_v35 = vcombine.high %v1536_v16, %v1552_v26 }
 0x4d3   : > { %4412 = vmatpush3.xpose.msk.msra.mxu0 %vm1921_vm3, %v1555_v31  ;;  %4416 = vmatprep.subr.mxu1 %v5280_v55  ;;  %v1245_v36 = vcombine.low %v1226_v61, %v1242_v62  ;;  %v1665_v37 = vcombine.low %v1630_v1, %v1638_v63  ;;  %v1666_v39 = vcombine.high %v1630_v1, %v1638_v63 }
 0x4d4   : > { %4421 = vmatprep.subr.mxu0 %v5280_v55  ;;  %v1246_v40 = vcombine.high %v1226_v61, %v1242_v62  ;;  %v1657_v41 = vrot.slane %v1649_v20, %v5963_v6  ;;  %v1287_v42 = vrot.slane %v1279_v60, %v5968_v15  ;;  %v1303_v43 = vrot.slane %v1295_v28, %v5968_v15 }
 0x4d5   : > { %4409 = vmatmul.mubr.msk.f32.vlgmr.msra.gmra.mrb[4].mxu1 %vm1921_vm3, %v1244_v33  ;;  %v1664_v44 = vrot.slane %v1650_v21, %v5963_v6  ;;  %v1673_v45 = vrot.slane %v1665_v37, %v5963_v6  ;;  %v1680_v46 = vrot.slane %v1666_v39, %v5963_v6  ;;  %v1622_v47 = vcombine.high %v1597_v9, %v1613_v56 }
 0x4d6   : > { %4414 = vmatmul.mubr.msk.f32.vlgmr.msra.gmra.mrb[0].mxu0 %vm1921_vm3, %v1245_v36  ;;  %4417 = vmatpush3.xpose.msk.msra.mxu1 %vm1921_vm3, %v1556_v35  ;;  %v1604_v48 = vrot.slane %v1590_v23, %v5968_v15  ;;  %v1620_v49 = vrot.slane %v1606_v25, %v5968_v15  ;;  %v1311_v58 = vcombine.low %v1287_v42, %v1303_v43 }
 0x4d7   : > { %4422 = vmatpush3.xpose.msk.msra.mxu0 %vm1921_vm3, %v1621_v34  ;;  %4418 = vmatprep.mubr.msk.f32.mxu1 %vm5282_vm2, %v5280_v55  ;;  %v1681_v50 = vcombine.low %v1657_v41, %v1673_v45  ;;  %v1682_v51 = vcombine.high %v1657_v41, %v1673_v45  ;;  %v1697_v52 = vcombine.low %v1664_v44, %v1680_v46 }
 0x4d8   : > { %4426 = vmatprep.subr.mxu1 %v5280_v55  ;;  %v1698_v57 = vcombine.high %v1664_v44, %v1680_v46  ;;  %4423 = vmatprep.mubr.msk.f32.mxu0 %vm5282_vm2, %v5280_v55  ;;  %v1312_v1 = vcombine.high %v1287_v42, %v1303_v43  ;;  %v1623_v7 = vcombine.low %v1604_v48, %v1620_v49 }
 0x4d9   : > { %4419 = vmatmul.mubr.msk.f32.vlgmr.msra.gmra.mrb[6].mxu1 %vm1921_vm3, %v1246_v40  ;;  %v1689_v2 = vrot.slane %v1681_v50, %v5968_v15  ;;  %v1696_v3 = vrot.slane %v1682_v51, %v5968_v15  ;;  %v1705_v4 = vrot.slane %v1697_v52, %v5968_v15  ;;  %4431 = vmatprep.subr.mxu0 %v5280_v55 }
 0x4da   : > { %4427 = vmatpush3.xpose.msk.msra.mxu1 %vm1921_vm3, %v1622_v47  ;;  %v1712_v5 = vrot.slane %v1698_v57, %v5968_v15  ;;  %4428 = vmatprep.mubr.msk.f32.mxu1 %vm5282_vm2, %v5280_v55  ;;  %v1294_v10 = vrot.slane %v1280_v0, %v5968_v15  ;;  %v1310_v11 = vrot.slane %v1296_v32, %v5968_v15  ;;  %v1628_v57 = vpop.permute.xlu0 %1627 }
 0x4db   : > { %v1785_v12 = vcombine.low %v1689_v2, %v1696_v3  ;;  %v4237_v13 = vcombine.high %v1689_v2, %v1696_v3  ;;  %4436 = vmatprep.subr.mxu1 %v5280_v55  ;;  %4424 = vmatmul.mubr.msk.f32.vlgmr.msra.gmra.mrb[2].mxu0 %vm1921_vm3, %v1311_v58  ;;  %v1624_v17 = vcombine.high %v1604_v48, %v1620_v49 }
 0x4dc   : > { %v1801_v14 = vcombine.low %v1705_v4, %v1712_v5  ;;  %v4238_v16 = vcombine.high %v1705_v4, %v1712_v5  ;;  %4432 = vmatpush3.xpose.msk.msra.mxu0 %vm1921_vm3, %v1623_v7  ;;  %4433 = vmatprep.mubr.msk.f32.mxu0 %vm5282_vm2, %v5280_v55  ;;  %v1313_v25 = vcombine.low %v1294_v10, %v1310_v11 }
 0x4dd   : > { %4429 = vmatmul.mubr.msk.f32.vlgmr.msra.gmra.mrb[8].mxu1 %vm1921_vm3, %v1312_v1  ;;  %v1792_v18 = vrot.slane %v1785_v12, %v5963_v6  ;;  %v1800_v19 = vrot.slane %v4237_v13, %v5963_v6  ;;  %v1314_v26 = vcombine.high %v1294_v10, %v1310_v11  ;;  %4441 = vmatprep.subr.mxu0 %v5280_v55 }
 0x4de   : > { %v1808_v22 = vrot.slane %v1801_v14, %v5963_v6  ;;  %v1816_v23 = vrot.slane %v4238_v16, %v5963_v6  ;;  %4437 = vmatpush3.xpose.msk.msra.mxu1 %vm1921_vm3, %v1624_v17  ;;  %4438 = vmatprep.mubr.msk.f32.mxu1 %vm5282_vm2, %v5280_v55 }
 0x4df   : > { %v1817_v24 = vcombine.low %v1792_v18, %v1800_v19  ;;  %v1818_v59 = vcombine.high %v1792_v18, %v1800_v19  ;;  %4434 = vmatmul.mubr.msk.f32.vlgmr.msra.gmra.mrb[4].mxu0 %vm1921_vm3, %v1313_v25  ;;  %4446 = vmatprep.subr.mxu1 %v5280_v55 }
 0x4e0   : > { %v1833_v27 = vcombine.low %v1808_v22, %v1816_v23  ;;  %v1834_v60 = vcombine.high %v1808_v22, %v1816_v23  ;;  %4443 = vmatprep.mubr.msk.f32.mxu0 %vm5282_vm2, %v5280_v55 }
 0x4e1   : > { %4439 = vmatmul.mubr.msk.f32.vlgmr.msra.gmra.mrb[10].mxu1 %vm1921_vm3, %v1314_v26  ;;  %v1825_v8 = vrot.slane %v1817_v24, %v5968_v15  ;;  %v6163_v56 = vrot.slane %v1818_v59, %v5968_v15 }
 0x4e2   : > { %v1841_v9 = vrot.slane %v1833_v27, %v5968_v15  ;;  %v6166_v28 = vrot.slane %v1834_v60, %v5968_v15  ;;  %4448 = vmatprep.mubr.msk.f32.mxu1 %vm5282_vm2, %v5280_v55 }
 0x4e4   : > { %v1849_v30 = vcombine.low %v1825_v8, %v1841_v9  ;;  %v1850_v31 = vcombine.high %v1825_v8, %v1841_v9  ;;  %v1851_v61 = vcombine.low %v6163_v56, %v6166_v28  ;;  %v1852_v62 = vcombine.high %v6163_v56, %v6166_v28 }
 0x4e6   : > { %4442 = vmatpush3.msra.mxu0 %v1849_v30  ;;  %4447 = vmatpush3.msra.mxu1 %v1850_v31 }
 0x4e7   : > { %4451 = vmatprep.subr.mxu0 %v5280_v55  ;;  %4456 = vmatprep.subr.mxu1 %v5280_v55 }
 0x5a4   : > { %v1994_v63 = vpop.f32.mrb[2].mxu1 }
 0x5a5   : > { %v4405_v0 = vpop.f32.mrb[3].mxu1  ;;  %v2530_v20 = vsel %vm1921_vm3, %v1994_v63, -inf }
 0x5a6   : > { %2531 = vmax.xlane.f32.xlu0 %v2530_v20 }
 0x5a8   : > { %v2070_v21 = vpop.f32.mrb[4].mxu1 }
 0x5a9   : > { %v2146_v32 = vpop.f32.mrb[0].mxu0  ;;  %v4410_v33 = vpop.f32.mrb[5].mxu1  ;;  %v2533_v34 = vsel %vm1921_vm3, %v2070_v21, -inf }
 0x5aa   : > { %v4415_v35 = vpop.f32.mrb[1].mxu0  ;;  %v2536_v36 = vsel %vm1921_vm3, %v2146_v32, -inf  ;;  %2534 = vmax.xlane.f32.xlu1 %v2533_v34 }
 0x5ab   : > { %2537 = vmax.xlane.f32.xlu0 %v2536_v36 }
 0x5ac   : > { %v2222_v37 = vpop.f32.mrb[6].mxu1 }
 0x5ad   : > { %v4420_v39 = vpop.f32.mrb[7].mxu1  ;;  %v2539_v49 = vsel %vm1921_vm3, %v2222_v37, -inf }
 0x5ae   : > { %v2298_v40 = vpop.f32.mrb[2].mxu0 }
 0x5af   : > { %v4425_v42 = vpop.f32.mrb[3].mxu0  ;;  %v2542_v45 = vsel %vm1921_vm3, %v2298_v40, -inf }
 0x5b0   : > { %v2374_v41 = vpop.f32.mrb[8].mxu1  ;;  %2543 = vmax.xlane.f32.xlu0 %v2542_v45 }
 0x5b1   : > { %v4430_v43 = vpop.f32.mrb[9].mxu1  ;;  %v2545_v44 = vsel %vm1921_vm3, %v2374_v41, -inf }
 0x5b2   : > { %2546 = vmax.xlane.f32.xlu1 %v2545_v44  ;;  %v2450_v46 = vpop.f32.mrb[4].mxu0 }
 0x5b3   : > { %v4435_v48 = vpop.f32.mrb[5].mxu0  ;;  %v2548_v52 = vsel %vm1921_vm3, %v2450_v46, -inf }
 0x5b4   : > { %v2526_v47 = vpop.f32.mrb[10].mxu1  ;;  %2540 = vmax.xlane.f32.xlu0 %v2539_v49 }
 0x5b5   : > { %v4440_v50 = vpop.f32.mrb[11].mxu1  ;;  %v2551_v51 = vsel %vm1921_vm3, %v2526_v47, -inf }
 0x5b6   : > { %2552 = vmax.xlane.f32.xlu1 %v2551_v51 }
 0x5b8   : > { %2549 = vmax.xlane.f32.xlu0 %v2548_v52 }
 0x5c7   : > { %1639 = vrot.lane.b32.xlu1 %v5938_v54, %s5281_s12 }
 0x5ce   : > { %1635 = vrot.lane.b32.xlu0 %v5936_v53, %s5281_s12 }
 0x633   : > { %v6188_v58 = vpop.xlane.xlu0 %2531 }
 0x634   : > { %v2578_v1 = vsub.f32 %v1994_v63, %v6188_v58 }
 0x636   : > { %v2586_v2 = vmul.f32 1.442695, %v2578_v1 }
 0x637   : > { %v6191_v3 = vpop.xlane.xlu1 %2534 }
 0x638   : > { %v2579_v4 = vsub.f32 %v2070_v21, %v6191_v3  ;;  %v6194_v5 = vpop.xlane.xlu0 %2537  ;;  %4711 = vpow2.f32 %v2586_v2 }
 0x639   : > { %v2580_v7 = vsub.f32 %v2146_v32, %v6194_v5 }
 0x63a   : > { %v2588_v10 = vmul.f32 1.442695, %v2579_v4 }
 0x63b   : > { %v2590_v54 = vmul.f32 1.442695, %v2580_v7 }
 0x63c   : > { %4713 = vpow2.f32 %v2588_v10 }
 0x63d   : > { %4715 = vpow2.f32 %v2590_v54  ;;  %v6199_v11 = vpop.xlane.xlu0 %2543 }
 0x63e   : > { %v2582_v13 = vsub.f32 %v2298_v40, %v6199_v11 }
 0x63f   : > { %v6197_v53 = vpop.xlane.xlu1 %2546 }
 0x640   : > { %v2583_v12 = vsub.f32 %v2374_v41, %v6197_v53  ;;  %v2594_v17 = vmul.f32 1.442695, %v2582_v13 }
 0x641   : > { %v6203_v18 = vpop.xlane.xlu0 %2540 }
 0x642   : > { %v2596_v14 = vmul.f32 1.442695, %v2583_v12  ;;  %v4712_v16 = vpop.eup %4711  ;;  %v2581_v23 = vsub.f32 %v2222_v37, %v6203_v18 }
 0x643   : > { %4444 = vmatmul.mubr.msk.f32.vlgmr.msra.gmra.mrb[6].mxu0 %vm1921_vm3, %v4712_v16  ;;  %v6206_v19 = vpop.xlane.xlu1 %2552  ;;  %v2610_v22 = vsel %vm1921_vm3, %v4712_v16, 0.0 }
 0x644   : > { %4717 = vpow2.f32 %v2596_v14  ;;  %4452 = vmatpush3.msra.mxu0 %v1851_v61  ;;  %v2585_v25 = vsub.f32 %v2526_v47, %v6206_v19  ;;  %2611 = vadd.xlane.f32.xlu0 %v2610_v22  ;;  %v2592_v27 = vmul.f32 1.442695, %v2581_v23 }
 0x645   : > { %4453 = vmatprep.mubr.msk.f32.mxu0 %vm5282_vm2, %v5280_v55  ;;  %4461 = vmatprep.subr.mxu0 %v5280_v55  ;;  %4719 = vpow2.f32 %v2594_v17  ;;  %v6217_v59 = vpop.xlane.xlu0 %2549 }
 0x646   : > { %v4714_v26 = vpop.eup %4713  ;;  %v2600_v24 = vmul.f32 1.442695, %v2585_v25  ;;  %v2584_v9 = vsub.f32 %v2450_v46, %v6217_v59 }
 0x647   : > { %4449 = vmatmul.mubr.msk.f32.vlgmr.msra.gmra.mrb[12].mxu1 %vm1921_vm3, %v4714_v26  ;;  %v2613_v60 = vsel %vm1921_vm3, %v4714_v26, 0.0  ;;  %v1640_v8 = vpop.permute.xlu1 %1639  ;;  %v4716_v30 = vpop.eup %4715 }
 0x648   : > { %4457 = vmatpush3.msra.mxu1 %v1852_v62  ;;  %2614 = vadd.xlane.f32.xlu1 %v2613_v60  ;;  %v1733_v31 = vcombine.low %v6042_v38, %v1640_v8  ;;  %4721 = vpow2.f32 %v2600_v24  ;;  %v1734_v61 = vcombine.high %v6042_v38, %v1640_v8  ;;  %v2616_v63 = vsel %vm1921_vm3, %v4716_v30, 0.0 }
 0x649   : > { %4454 = vmatmul.mubr.msk.f32.vlgmr.msra.gmra.mrb[8].mxu0 %vm1921_vm3, %v4716_v30  ;;  %v2598_v0 = vmul.f32 1.442695, %v2584_v9  ;;  %4458 = vmatprep.mubr.msk.f32.mxu1 %vm5282_vm2, %v5280_v55  ;;  %4723 = vpow2.f32 %v2592_v27  ;;  %v1636_v20 = vpop.permute.xlu0 %1635  ;;  %v2554_v8 = vsub.f32 -inf, %v6188_v58  ;;  %v2555_v30 = vsub.f32 -inf, %v6191_v3 }
 0x64a   : > { %2617 = vadd.xlane.f32.xlu0 %v2616_v63  ;;  %4466 = vmatprep.subr.mxu1 %v5280_v55  ;;  %v1717_v56 = vcombine.low %v1628_v57, %v1636_v20  ;;  %v1718_v28 = vcombine.high %v1628_v57, %v1636_v20  ;;  %v1741_v62 = vrot.slane %v1733_v31, %v5963_v6  ;;  %v2556_v31 = vsub.f32 -inf, %v6194_v5 }
 0x64b   : > { %4463 = vmatprep.mubr.msk.f32.mxu0 %vm5282_vm2, %v5280_v55  ;;  %4725 = vpow2.f32 %v2598_v0  ;;  %v1748_v38 = vrot.slane %v1734_v61, %v5963_v6  ;;  %v2562_v9 = vmul.f32 1.442695, %v2554_v8  ;;  %v2564_v61 = vmul.f32 1.442695, %v2555_v30 }
 0x64c   : > { %v1725_v21 = vrot.slane %v1717_v56, %v5963_v6  ;;  %v1732_v32 = vrot.slane %v1718_v28, %v5963_v6  ;;  %v2566_v63 = vmul.f32 1.442695, %v2556_v31  ;;  %v2557_v20 = vsub.f32 -inf, %v6203_v18 }
 0x64d   : > { %4727 = vpow2.f32 %v2562_v9  ;;  %v2559_v3 = vsub.f32 -inf, %v6197_v53  ;;  %v2561_v18 = vsub.f32 -inf, %v6206_v19 }
 0x64e   : > { %v4718_v33 = vpop.eup %4717  ;;  %v1749_v34 = vcombine.low %v1725_v21, %v1741_v62  ;;  %v1750_v35 = vcombine.high %v1725_v21, %v1741_v62  ;;  %v1765_v36 = vcombine.low %v1732_v32, %v1748_v38  ;;  %v1766_v37 = vcombine.high %v1732_v32, %v1748_v38 }
 0x64f   : > { %v4720_v39 = vpop.eup %4719  ;;  %v2625_v40 = vsel %vm1921_vm3, %v4718_v33, 0.0  ;;  %4729 = vpow2.f32 %v2564_v61  ;;  %v2568_v62 = vmul.f32 1.442695, %v2557_v20 }
 0x650   : > { %v1757_v41 = vrot.slane %v1749_v34, %v5968_v15  ;;  %v1764_v42 = vrot.slane %v1750_v35, %v5968_v15  ;;  %v1773_v43 = vrot.slane %v1765_v36, %v5968_v15  ;;  %v1780_v44 = vrot.slane %v1766_v37, %v5968_v15  ;;  %2626 = vadd.xlane.f32.xlu1 %v2625_v40 }
 0x651   : > { %v2622_v45 = vsel %vm1921_vm3, %v4720_v39, 0.0  ;;  %4731 = vpow2.f32 %v2566_v63  ;;  %v2572_v37 = vmul.f32 1.442695, %v2559_v3  ;;  %v2560_v40 = vsub.f32 -inf, %v6217_v59 }
 0x652   : > { %v4722_v46 = vpop.eup %4721  ;;  %v1853_v47 = vcombine.low %v1757_v41, %v1764_v42  ;;  %v4239_v48 = vcombine.high %v1757_v41, %v1764_v42  ;;  %v1869_v49 = vcombine.low %v1773_v43, %v1780_v44  ;;  %v4240_v50 = vcombine.high %v1773_v43, %v1780_v44  ;;  %2623 = vadd.xlane.f32.xlu0 %v2622_v45 }
 0x653   : > { %v4724_v51 = vpop.eup %4723  ;;  %v2631_v52 = vsel %vm1921_vm3, %v4722_v46, 0.0  ;;  %4733 = vpow2.f32 %v2568_v62  ;;  %v2576_v42 = vmul.f32 1.442695, %v2561_v18  ;;  %v2574_v53 = vmul.f32 1.442695, %v2560_v40 }
 0x654   : > { %v1860_v57 = vrot.slane %v1853_v47, %v5963_v6  ;;  %v1868_v1 = vrot.slane %v4239_v48, %v5963_v6  ;;  %v1876_v2 = vrot.slane %v1869_v49, %v5963_v6  ;;  %v1884_v4 = vrot.slane %v4240_v50, %v5963_v6  ;;  %4459 = vmatmul.mubr.msk.f32.vlgmr.msra.gmra.mrb[14].mxu1 %vm1921_vm3, %v4724_v51 }
 0x655   : > { %v4726_v7 = vpop.eup %4725  ;;  %2632 = vadd.xlane.f32.xlu1 %v2631_v52  ;;  %v2619_v10 = vsel %vm1921_vm3, %v4724_v51, 0.0  ;;  %4468 = vmatprep.mubr.msk.f32.mxu1 %vm5282_vm2, %v5280_v55 }
 0x656   : > { %2620 = vadd.xlane.f32.xlu0 %v2619_v10  ;;  %v1885_v54 = vcombine.low %v1860_v57, %v1868_v1  ;;  %v1901_v12 = vcombine.low %v1876_v2, %v1884_v4  ;;  %v1886_v13 = vcombine.high %v1860_v57, %v1868_v1  ;;  %v2628_v14 = vsel %vm1921_vm3, %v4726_v7, 0.0 }
 0x657   : > { %v1902_v16 = vcombine.high %v1876_v2, %v1884_v4  ;;  %v4728_v0 = vpop.eup %4727 }
 0x658   : > { %v1893_v17 = vrot.slane %v1885_v54, %v5968_v15  ;;  %v1909_v22 = vrot.slane %v1901_v12, %v5968_v15  ;;  %v1900_v23 = vrot.slane %v1886_v13, %v5968_v15  ;;  %v2602_v56 = vmul.f32 0.0, %v4728_v0 }
 0x659   : > { %v1916_v25 = vrot.slane %v1902_v16, %v5968_v15  ;;  %v4730_v28 = vpop.eup %4729 }
 0x65a   : > { %2629 = vadd.xlane.f32.xlu0 %v2628_v14  ;;  %v1917_v26 = vcombine.low %v1893_v17, %v1909_v22  ;;  %v1918_v24 = vcombine.high %v1893_v17, %v1909_v22  ;;  %v2603_v32 = vmul.f32 0.0, %v4730_v28 }
 0x65b   : > { %v1919_v27 = vcombine.low %v1900_v23, %v1916_v25  ;;  %v1920_v60 = vcombine.high %v1900_v23, %v1916_v25  ;;  %v4732_v21 = vpop.eup %4731 }
 0x65c   : > { %4462 = vmatpush3.msra.mxu0 %v1917_v26  ;;  %4467 = vmatpush3.msra.mxu1 %v1918_v24  ;;  %v2604_v35 = vmul.f32 0.0, %v4732_v21 }
 0x65d   : > { %4464 = vmatmul.mubr.msk.f32.vlgmr.msra.gmra.mrb[10].mxu0 %vm1921_vm3, %v4720_v39  ;;  %4469 = vmatmul.mubr.msk.f32.vlgmr.msra.gmra.mrb[16].mxu1 %vm1921_vm3, %v4718_v33  ;;  %v2558_v33 = vsub.f32 -inf, %v6199_v11  ;;  %v4734_v44 = vpop.eup %4733 }
 0x65e   : > { %4471 = vmatprep.subr.mxu0 %v5280_v55  ;;  %4476 = vmatprep.subr.mxu1 %v5280_v55  ;;  %v2605_v19 = vmul.f32 0.0, %v4734_v44 }
 0x65f   : > { %4472 = vmatpush3.msra.mxu0 %v1919_v27  ;;  %4477 = vmatpush3.msra.mxu1 %v1920_v60  ;;  %v2570_v39 = vmul.f32 1.442695, %v2558_v33 }
 0x660   : > { %4473 = vmatprep.mubr.msk.f32.mxu0 %vm5282_vm2, %v5280_v55  ;;  %4478 = vmatprep.mubr.msk.f32.mxu1 %vm5282_vm2, %v5280_v55 }
 0x661   : > { %4474 = vmatmul.mubr.msk.f32.vlgmr.msra.gmra.mrb[12].mxu0 %vm1921_vm3, %v4726_v7  ;;  %4479 = vmatmul.mubr.msk.f32.vlgmr.msra.gmra.mrb[18].mxu1 %vm1921_vm3, %v4722_v46 }
 0x6d1   : > { %v2612_v55 = vpop.xlane.xlu0 %2611 }
 0x6d2   : > { %v2634_v38 = vadd.f32 %v2612_v55, %v2602_v56 }
 0x6d4   : > { %4735 = vrcp.f32 %v2634_v38 }
 0x6d5   : > { %v2615_v58 = vpop.xlane.xlu1 %2614 }
 0x6d6   : > { %v2635_v34 = vadd.f32 %v2615_v58, %v2603_v32 }
 0x6d7   : > { %v2618_v5 = vpop.xlane.xlu0 %2617 }
 0x6d8   : > { %v2636_v36 = vadd.f32 %v2618_v5, %v2604_v35  ;;  %4737 = vrcp.f32 %v2635_v34 }
 0x6da   : > { %4739 = vrcp.f32 %v2636_v36 }
 0x6db   : > { %4741 = vpow2.f32 %v2572_v37 }
 0x6dc   : > { %4743 = vpow2.f32 %v2570_v39 }
 0x6dd   : > { %4745 = vpow2.f32 %v2576_v42  ;;  %v2627_v54 = vpop.xlane.xlu1 %2626 }
 0x6de   : > { %v4736_v46 = vpop.eup %4735  ;;  %4747 = vpow2.f32 %v2574_v53 }
 0x6df   : > { %v2624_v41 = vpop.xlane.xlu0 %2623 }
 0x6e2   : > { %v4738_v51 = vpop.eup %4737  ;;  %v2633_v27 = vpop.xlane.xlu1 %2632 }
 0x6e3   : > { %v2621_v47 = vpop.xlane.xlu0 %2620 }
 0x6e4   : > { %v2637_v52 = vadd.f32 %v2621_v47, %v2605_v19  ;;  %v4740_v7 = vpop.eup %4739 }
 0x6e5   : > { %v4742_v10 = vpop.eup %4741 }
 0x6e6   : > { %v4744_v13 = vpop.eup %4743  ;;  %4749 = vrcp.f32 %v2637_v52  ;;  %v2607_v17 = vmul.f32 0.0, %v4742_v10 }
 0x6e7   : > { %v4746_v22 = vpop.eup %4745  ;;  %v2606_v23 = vmul.f32 0.0, %v4744_v13  ;;  %v2630_v8 = vpop.xlane.xlu0 %2629 }
 0x6e8   : > { %v4748_v25 = vpop.eup %4747  ;;  %v2639_v26 = vadd.f32 %v2627_v54, %v2607_v17  ;;  %v2609_v60 = vmul.f32 0.0, %v4746_v22 }
 0x6e9   : > { %v2638_v24 = vadd.f32 %v2624_v41, %v2606_v23  ;;  %v2608_v9 = vmul.f32 0.0, %v4748_v25 }
 0x6ea   : > { %4751 = vrcp.f32 %v2639_v26  ;;  %v2641_v30 = vadd.f32 %v2633_v27, %v2609_v60 }
 0x6eb   : > { %4753 = vrcp.f32 %v2638_v24  ;;  %v2640_v61 = vadd.f32 %v2630_v8, %v2608_v9 }
 0x6ec   : > { %4755 = vrcp.f32 %v2641_v30 }
 0x6ed   : > { %4757 = vrcp.f32 %v2640_v61 }
 0x6f0   : > { %v4750_v20 = vpop.eup %4749 }
 0x6f4   : > { %v4752_v36 = vpop.eup %4751 }
 0x6f5   : > { %v4754_v41 = vpop.eup %4753 }
 0x716   : > { %v2711_v43 = vpop.f32.mrb[6].mxu0 }
 0x717   : > { %v3226_v11 = vadd.f32 %v2711_v43, %v2602_v56  ;;  %v4445_v45 = vpop.f32.mrb[7].mxu0 }
 0x719   : > { %v3242_v48 = vmul.f32 %v4736_v46, %v3226_v11 }
 0x71a   : > { %v2784_v49 = vpop.f32.mrb[12].mxu1 }
 0x71b   : > { %v3227_v50 = vadd.f32 %v2784_v49, %v2603_v32  ;;  %v4450_v59 = vpop.f32.mrb[13].mxu1 }
 0x71c   : > { %v2857_v57 = vpop.f32.mrb[8].mxu0  ;;  %v4756_v59 = vpop.eup %4755 }
 0x71d   : > { %v3243_v1 = vmul.f32 %v4738_v51, %v3227_v50  ;;  %v3228_v2 = vadd.f32 %v2857_v57, %v2604_v35  ;;  %v4455_v4 = vpop.f32.mrb[9].mxu0 }
 0x71f   : > { %v3244_v12 = vmul.f32 %v4740_v7, %v3228_v2  ;;  %v4758_v2 = vpop.eup %4757 }
 0x721   : > { %v3250_v14 = vcombine.low %v3242_v48, %v3244_v12  ;;  %v3251_v16 = vcombine.high %v3242_v48, %v3244_v12 }
 0x723   : > { %v3258_v62 = vrot.slane %v3250_v14, %v5963_v6  ;;  %v3265_v38 = vrot.slane %v3251_v16, %v5963_v6 }
 0x727   : > { %v2930_v31 = vpop.f32.mrb[14].mxu1 }
 0x728   : > { %v3229_v63 = vadd.f32 %v2930_v31, %v2605_v19  ;;  %v4460_v0 = vpop.f32.mrb[15].mxu1 }
 0x72a   : > { %v3245_v55 = vmul.f32 %v4750_v20, %v3229_v63 }
 0x72c   : > { %v3266_v56 = vcombine.low %v3243_v1, %v3245_v55  ;;  %v3267_v28 = vcombine.high %v3243_v1, %v3245_v55 }
 0x72e   : > { %v3274_v21 = vrot.slane %v3266_v56, %v5963_v6  ;;  %v3281_v58 = vrot.slane %v3267_v28, %v5963_v6 }
 0x730   : > { %v3282_v32 = vcombine.low %v3258_v62, %v3274_v21  ;;  %v3283_v3 = vcombine.high %v3258_v62, %v3274_v21  ;;  %v3298_v5 = vcombine.low %v3265_v38, %v3281_v58  ;;  %v3299_v33 = vcombine.high %v3265_v38, %v3281_v58  ;;  %v3003_v34 = vpop.f32.mrb[10].mxu0  ;;  %v3076_v35 = vpop.f32.mrb[16].mxu1  ;;  %v4293_v58 = vld [vmem:[%s718_s8] sm:$0xff]  }
 0x731   : > { %v3230_v37 = vadd.f32 %v3003_v34, %v2606_v23  ;;  %v3231_v18 = vadd.f32 %v3076_v35, %v2607_v17  ;;  %v4465_v39 = vpop.f32.mrb[11].mxu0  ;;  %v4470_v40 = vpop.f32.mrb[17].mxu1  ;;  %4531 = vmatprep.subr.bf16.mxu0 %v4293_v58 }
 0x732   : > { %v3290_v42 = vrot.slane %v3282_v32, %v5968_v15  ;;  %v3297_v53 = vrot.slane %v3283_v3, %v5968_v15  ;;  %v3306_v43 = vrot.slane %v3298_v5, %v5968_v15  ;;  %v3313_v44 = vrot.slane %v3299_v33, %v5968_v15  ;;  %4533 = vmatpush3.bf16.msra.mxu0 %v4293_v58  ;;  %v4309_v58 = vld [vmem:[%s5890_s5] sm:$0xff]  }
 0x733   : > { %v3246_v11 = vmul.f32 %v4754_v41, %v3230_v37  ;;  %v3247_v45 = vmul.f32 %v4752_v36, %v3231_v18  ;;  %v4325_v18 = vld [vmem:[%s718_s8 + $0x8] sm:$0xff]   ;;  %s6491_s8 = sld [smem:[#allocation34_spill]] }
 0x734   : > { %v3149_v46 = vpop.f32.mrb[12].mxu0  ;;  %v3222_v47 = vpop.f32.mrb[18].mxu1  ;;  %v3386_v48 = vcombine.low %v3290_v42, %v3297_v53  ;;  %v4265_v19 = vcombine.high %v3290_v42, %v3297_v53  ;;  %v3402_v49 = vcombine.low %v3306_v43, %v3313_v44  ;;  %v4266_v50 = vcombine.high %v3306_v43, %v3313_v44  ;;  %4535 = vmatprep.subr.bf16.mxu0 %v4325_v18 }
 0x735   : > { %v3232_v51 = vadd.f32 %v3149_v46, %v2608_v9  ;;  %v3233_v52 = vadd.f32 %v3222_v47, %v2609_v60  ;;  %v4475_v57 = vpop.f32.mrb[13].mxu0  ;;  %v4480_v1 = vpop.f32.mrb[19].mxu1 }
 0x736   : > { %v3393_v4 = vrot.slane %v3386_v48, %v5963_v6  ;;  %v3401_v7 = vrot.slane %v4265_v19, %v5963_v6  ;;  %v3409_v10 = vrot.slane %v3402_v49, %v5963_v6  ;;  %v3417_v54 = vrot.slane %v4266_v50, %v5963_v6  ;;  %4537 = vmatpush3.bf16.msra.mxu0 %v4325_v18  ;;  %v878_v18 = vld [vmem:[%s734_s18] sm:$0x1] }
 0x737   : > { %v3248_v12 = vmul.f32 %v4758_v2, %v3232_v51  ;;  %v3249_v13 = vmul.f32 %v4756_v59, %v3233_v52  ;;  %4547 = vmatprep.subr.bf16.mxu0 %v4309_v58 }
 0x738   : > { %v3419_v14 = vcombine.high %v3393_v4, %v3401_v7  ;;  %v3435_v16 = vcombine.high %v3409_v10, %v3417_v54  ;;  %v3418_v17 = vcombine.low %v3393_v4, %v3401_v7  ;;  %v3434_v22 = vcombine.low %v3409_v10, %v3417_v54 }
 0x739   : > { %v3318_v23 = vcombine.low %v3246_v11, %v3248_v12  ;;  %v3319_v25 = vcombine.high %v3246_v11, %v3248_v12  ;;  %v3334_v26 = vcombine.low %v3247_v45, %v3249_v13  ;;  %v3335_v24 = vcombine.high %v3247_v45, %v3249_v13  ;;  %v884_v13 = vld [vmem:[%s726_s13] sm:$0x1]  ;;  %p4275_p2 = scmp.ne.s32.totalorder %s6491_s8, 1 }
 0x73a   : > { %v3433_v27 = vrot.slane %v3419_v14, %v5968_v15  ;;  %v3449_v60 = vrot.slane %v3435_v16, %v5968_v15  ;;  %v3426_v8 = vrot.slane %v3418_v17, %v5968_v15  ;;  %v3442_v9 = vrot.slane %v3434_v22, %v5968_v15 }
 0x73b   : > { %v3326_v30 = vrot.slane %v3318_v23, %v5963_v6  ;;  %v3333_v31 = vrot.slane %v3319_v25, %v5963_v6  ;;  %v3342_v61 = vrot.slane %v3334_v26, %v5963_v6  ;;  %v3349_v63 = vrot.slane %v3335_v24, %v5963_v6  ;;  %v4763_v26 = vld [vmem:[#allocation2 + $0x8] sm:$0xff] }
 0x73c   : > { %v3452_v0 = vcombine.low %v3433_v27, %v3449_v60  ;;  %v3451_v20 = vcombine.high %v3426_v8, %v3442_v9  ;;  %v3453_v55 = vcombine.high %v3433_v27, %v3449_v60  ;;  %v3450_v56 = vcombine.low %v3426_v8, %v3442_v9  ;;  %v4764_v27 = vld [vmem:[#allocation2] sm:$0xff] }
 0x73d   : > { %v3350_v28 = vcombine.low %v3326_v30, %v3342_v61  ;;  %v3351_v62 = vcombine.high %v3326_v30, %v3342_v61  ;;  %v3366_v38 = vcombine.low %v3333_v31, %v3349_v63  ;;  %v3367_v21 = vcombine.high %v3333_v31, %v3349_v63 }
 0x73e   : > { %3532 = vrot.lane.b32.xlu1 %v3452_v0, %s5285_s10  ;;  %3524 = vrot.lane.b32.xlu0 %v3451_v20, %s5286_s19  ;;  %v885_v14 = vunpack.c.l.bf16 %v884_v13 }
 0x73f   : > { %v3358_v32 = vrot.slane %v3350_v28, %v5968_v15  ;;  %v3365_v3 = vrot.slane %v3351_v62, %v5968_v15  ;;  %v3374_v5 = vrot.slane %v3366_v38, %v5968_v15  ;;  %v3381_v33 = vrot.slane %v3367_v21, %v5968_v15  ;;  %v4301_v38 = vld [vmem:[%s751_s0] sm:$0xff]   ;;  %v4326_v21 = vld [vmem:[%s751_s0 + $0x8] sm:$0xff]  }
 0x740   : > { %v3565_v16 = vrot.slane %v885_v14, %v5913_v29  ;;  %4539 = vmatprep.subr.bf16.mxu1 %v4301_v38 }
 0x741   : > { %v3454_v34 = vcombine.low %v3358_v32, %v3365_v3  ;;  %v4267_v35 = vcombine.high %v3358_v32, %v3365_v3  ;;  %v3470_v36 = vcombine.low %v3374_v5, %v3381_v33  ;;  %v4268_v37 = vcombine.high %v3374_v5, %v3381_v33  ;;  %4541 = vmatpush3.bf16.msra.mxu1 %v4301_v38  ;;  %v4327_v32 = vld [vmem:[%s5890_s5 + $0x8] sm:$0xff]   ;;  %v4328_v3 = vld [vmem:[%s5890_s5 + $0x10] sm:$0xff]  }
 0x742   : > { %3540 = vrot.lane.b32.xlu0 %v3453_v55, %s5287_s16  ;;  %4543 = vmatprep.subr.bf16.mxu1 %v4326_v21 }
 0x743   : > { %v3461_v39 = vrot.slane %v3454_v34, %v5963_v6  ;;  %v3469_v40 = vrot.slane %v4267_v35, %v5963_v6  ;;  %v3477_v41 = vrot.slane %v3470_v36, %v5963_v6  ;;  %v3485_v42 = vrot.slane %v4268_v37, %v5963_v6 }
 0x745   : > { %v3486_v53 = vcombine.low %v3461_v39, %v3469_v40  ;;  %v3502_v43 = vcombine.low %v3477_v41, %v3485_v42  ;;  %v3487_v44 = vcombine.high %v3461_v39, %v3469_v40  ;;  %v3503_v11 = vcombine.high %v3477_v41, %v3485_v42  ;;  %4545 = vmatpush3.bf16.msra.mxu1 %v4326_v21  ;;  %v880_v39 = vld [vmem:[%s6490_s27] sm:$0x1] }
 0x746   : > { %v879_v40 = vunpack.c.l.bf16 %v878_v18  ;;  %v881_v41 = vunpack.c.l.bf16 %v880_v39 }
 0x747   : > { %v3494_v45 = vrot.slane %v3486_v53, %v5968_v15  ;;  %v3510_v46 = vrot.slane %v3502_v43, %v5968_v15  ;;  %v3501_v47 = vrot.slane %v3487_v44, %v5968_v15  ;;  %v3517_v48 = vrot.slane %v3503_v11, %v5968_v15 }
 0x748   : > { %v3678_v42 = vrot.slane %v879_v40, %v5913_v29  ;;  %v3684_v44 = vrot.slane %v881_v41, %v5913_v29 }
 0x749   : > { %v3519_v19 = vcombine.high %v3494_v45, %v3510_v46  ;;  %v3520_v49 = vcombine.low %v3501_v47, %v3517_v48  ;;  %v3521_v50 = vcombine.high %v3501_v47, %v3517_v48  ;;  %v3518_v59 = vcombine.low %v3494_v45, %v3510_v46 }
 0x74b   : > { %3526 = vrot.lane.b32.xlu1 %v3519_v19, %s5286_s19 }
 0x74f   : > { %3534 = vrot.lane.b32.xlu1 %v3520_v49, %s5285_s10  ;;  %v4329_v49 = vld [vmem:[%s5890_s5 + $0x18] sm:$0xff]  }
 0x753   : > { %3542 = vrot.lane.b32.xlu1 %v3521_v50, %s5287_s16  ;;  %v3695_v50 = vld [vmem:[%s759_s17] sm:$0x1] }
 0x7b0   : > { %v3525_v6 = vpop.permute.xlu0 %3524  ;;  %v3533_v51 = vpop.permute.xlu1 %3532 }
 0x7b1   : > { %v3546_v52 = vsel %vm1921_vm3, %v3450_v56, %v3525_v6 }
 0x7b2   : > { %v3549_v57 = vsel %vm3548_vm4, %v3546_v52, %v3533_v51 }
 0x7b4   : > { %v3541_v1 = vpop.permute.xlu0 %3540 }
 0x7b5   : > { %v3552_v2 = vsel %vm3551_vm5, %v3549_v57, %v3541_v1 }
 0x7b6   : > { %4489 = vmatprep.mubr.msk.f32.mxu0 %vm888_vm1, %v3552_v2 }
 0x7bd   : > { %v3527_v15 = vpop.permute.xlu1 %3526 }
 0x7be   : > { %v3547_v7 = vsel %vm1921_vm3, %v3518_v59, %v3527_v15  ;;  %v3696_v59 = vunpack.c.l.bf16 %v3695_v50 }
 0x7c0   : > { %v3716_v6 = vrot.slane %v3696_v59, %v5913_v29 }
 0x7c1   : > { %v3535_v4 = vpop.permute.xlu1 %3534 }
 0x7c2   : > { %v3550_v10 = vsel %vm3548_vm4, %v3547_v7, %v3535_v4  ;;  %v886_v4 = vld [vmem:[%s776_s3] sm:$0x1] }
 0x7c3   : > { %v887_v7 = vunpack.c.l.bf16 %v886_v4 }
 0x7c5   : > { %v3543_v54 = vpop.permute.xlu1 %3542 }
 0x7c6   : > { %v3553_v12 = vsel %vm3551_vm5, %v3550_v10, %v3543_v54  ;;  %v3887_v10 = vrot.slane %v887_v7, %v5913_v29 }
 0x7c7   : > { %4490 = vmatmul.mubr.msk.f32.vlgmr.msra.gmra.mrb[14].mxu0 %vm888_vm1, %v3553_v12 }
 0x7c8   : > { %4549 = vmatpush3.bf16.msra.mxu0 %v4309_v58 }
 0x7c9   : > { %4551 = vmatprep.subr.bf16.mxu0 %v4327_v32 }
 0x7cc   : > { %4553 = vmatpush3.bf16.msra.mxu0 %v4327_v32 }
 0x7cd   : > { %4555 = vmatprep.subr.bf16.mxu0 %v4328_v3 }
 0x7d0   : > { %4557 = vmatpush3.bf16.msra.mxu0 %v4328_v3 }
 0x7d1   : > { %4559 = vmatprep.subr.bf16.mxu0 %v4329_v49 }
 0x7d4   : > { %4561 = vmatpush3.bf16.msra.mxu0 %v4329_v49 }
 0x89a   : > { %v4491_v17 = vpop.f32.mrb[14].mxu0 }
 0x89b   : > { %v3644_v22 = vadd.f32 %v4491_v17, %v3565_v16  ;;  %v3638_v23 = vpop.f32.mrb[15].mxu0 }
 0x89c   : > { %v3639_v25 = vadd.f32 %v3638_v23, %v3565_v16 }
 0x89d   : > { %v6323_v24 = vadd.f32 %v4763_v26, %v3644_v22 }
 0x89e   : > { %v6325_v60 = vadd.f32 %v4764_v27, %v3639_v25 }
 0x89f   : > { %v3652_v8 = vsel %vm888_vm1, %v6323_v24, 0.0 }
 0x8a0   : > { %3653 = vadd.xlane.f32.xlu1 %v3652_v8  ;;  %v3649_v9 = vsel %vm888_vm1, %v6325_v60, 0.0 }
 0x8a1   : > { %3650 = vadd.xlane.f32.xlu0 %v3649_v9 }
 0x92d   : > { %v3654_v30 = vpop.xlane.xlu1 %3653 }
 0x92e   : > { %v3656_v31 = vmul.f32 0.03125, %v3654_v30  ;;  %v3651_v61 = vpop.xlane.xlu0 %3650 }
 0x92f   : > { %v3655_v63 = vmul.f32 0.03125, %v3651_v61 }
 0x930   : > { %v3658_v0 = vsub.f32 %v6323_v24, %v3656_v31 }
 0x931   : > { %v3657_v20 = vsub.f32 %v6325_v60, %v3655_v63 }
 0x932   : > { %v3660_v28 = vmul.f32 %v3658_v0, %v3658_v0 }
 0x933   : > { %v3659_v55 = vmul.f32 %v3657_v20, %v3657_v20 }
 0x934   : > { %v3664_v62 = vsel %vm888_vm1, %v3660_v28, 0.0 }
 0x935   : > { %v3661_v56 = vsel %vm888_vm1, %v3659_v55, 0.0 }
 0x936   : > { %3662 = vadd.xlane.f32.xlu0 %v3661_v56 }
 0x93a   : > { %3665 = vadd.xlane.f32.xlu0 %v3664_v62 }
 0x9c3   : > { %v3663_v5 = vpop.xlane.xlu0 %3662 }
 0x9c4   : > { %v3667_v33 = vmul.f32 0.03125, %v3663_v5 }
 0x9c6   : > { %v3669_v34 = vadd.f32 1e-05, %v3667_v33 }
 0x9c7   : > { %v3666_v35 = vpop.xlane.xlu0 %3665 }
 0x9c8   : > { %4759 = vrsqrt.f32 %v3669_v34  ;;  %v3668_v36 = vmul.f32 0.03125, %v3666_v35 }
 0x9ca   : > { %v3670_v37 = vadd.f32 1e-05, %v3668_v36 }
 0x9cc   : > { %4761 = vrsqrt.f32 %v3670_v37 }
 0x9d2   : > { %v4760_v53 = vpop.eup %4759 }
 0x9d3   : > { %v3673_v43 = vmul.f32 %v4760_v53, %v3657_v20 }
 0x9d5   : > { %v3679_v11 = vmul.f32 %v3678_v42, %v3673_v43 }
 0x9d6   : > { %v4762_v45 = vpop.eup %4761 }
 0x9d7   : > { %v3674_v46 = vmul.f32 %v4762_v45, %v3658_v0  ;;  %v3685_v47 = vadd.f32 %v3684_v44, %v3679_v11 }
 0x9d9   : > { %v3680_v48 = vmul.f32 %v3678_v42, %v3674_v46  ;;  %4500 = vmatprep.mubr.msk.f32.mxu1 %vm888_vm1, %v3685_v47 }
 0x9db   : > { %v3686_v19 = vadd.f32 %v3684_v44, %v3680_v48 }
 0x9dd   : > { %4501 = vmatmul.mubr.msk.f32.vlgmr.msra.gmra.mrb[20].mxu1 %vm888_vm1, %v3686_v19 }
 0xab0   : > { %v4502_v51 = vpop.f32.mrb[20].mxu1 }
 0xab1   : > { %v3795_v52 = vadd.f32 %v4502_v51, %v3716_v6  ;;  %v3789_v57 = vpop.f32.mrb[21].mxu1 }
 0xab2   : > { %v3790_v1 = vadd.f32 %v3789_v57, %v3716_v6 }
 0xab3   : > { %v3799_v15 = vmax.f32 %v3795_v52, 0.0 }
 0xab4   : > { %v3798_v2 = vmax.f32 %v3790_v1, 0.0 }
 0xab6   : > { %4519 = vmatprep.mubr.msk.f32.mxu0 %vm3800_vm6, %v3798_v2 }
 0xab7   : > { %4520 = vmatmul.mubr.msk.f32.vlgmr.msra.gmra.mrb[16].mxu0 %vm3800_vm6, %v3799_v15 }
 0xb8a   : > { %v4521_v54 = vpop.f32.mrb[16].mxu0  ;;  %3895 = sbr.rel (%p4275_p2) target bundleno = 2961 (0xb91), region = 132 }
 0xb8b   : > { %v3883_v12 = vadd.f32 %v4521_v54, %v6323_v24  ;;  %v3873_v13 = vpop.f32.mrb[17].mxu0 }
 0xb8c   : > { %v3882_v14 = vadd.f32 %v3873_v13, %v6325_v60 }
 0xb8d   : > { %v3889_v16 = vadd.f32 %v3887_v10, %v3883_v12 }
 0xb8e   : > { %v3888_v17 = vadd.f32 %v3887_v10, %v3882_v14 }
 0xb8f   : > { %3891 = vst.msk [vmem:[#allocation2 + $0x8] sm:$0xff] %vm888_vm1, %v3889_v16  ;;  %3897 = vst.msk [vmem:[#allocation24 + $0x8] sm:$0xff] (!%p4275_p2), %vm888_vm1, %v3889_v16 }
 0xb90   : > { %3890 = vst.msk [vmem:[#allocation2] sm:$0xff] %vm888_vm1, %v3888_v17  ;;  %3896 = vst.msk [vmem:[#allocation24] sm:$0xff] (!%p4275_p2), %vm888_vm1, %v3888_v17 }
 0xb91 PF: > { %p4638_p5 = scmp.eq.s32.totalorder %s5635_s24, 1  ;;  %s5288_s14 = smov [#allocation24]  }
 0xb92   : > { %s3907_s13 = sshll.u32 %s5288_s14, 4  ;;  %s3908_s13 = int_to_ptr.vmem [resolvable:$true] %s3907_s13 }
 0xb93   : > { %s5153_s18 = scalar_lea.vmem %s3908_s13, 256  ;;  %p5160_p13 = scmp.lt.s32.totalorder %s3908_s13, %s3908_s13 }
 0xb94   : > { %p5154_p10 = scmp.ne.s32.totalorder %s3908_s13, %s5153_s18  ;;  %p5161_p8 = scmp.lt.s32.totalorder %s5153_s18, %s5153_s18 }
 0xb96   : > { %p5155_p1 = pnand %p5154_p10, %p4638_p5  ;;  %p5162_p6 = por %p5161_p8, %p5160_p13 }
 0xb98   : > { %p5156_p4 = pneg %p5155_p1 }
 0xb9a   : > { %p5163_p11 = pnand %p5162_p6, %p5156_p4 }
 0xb9c   : > { %5166 = shalt.err (!%p5163_p11)
}
 0xb9d   : > { %s6492_s17 = sld [smem:[#allocation45_spill]] }
 0xba3   : > { %s5167_s1 = scalar_lea.hbm %s6492_s17, 256 }
 0xba4   : > { %p5168_p3 = scmp.ne.s32.totalorder %s6492_s17, %s5167_s1  ;;  %p5173_p12 = scmp.lt.u32.totalorder %s5167_s1, %s6492_s17 }
 0xba6   : > { %p5169_p0 = pnand %p5168_p3, %p4638_p5 }
 0xba8   : > { %p5170_p9 = pneg %p5169_p0 }
 0xbaa   : > { %p5175_p7 = pnand %p5173_p12, %p5170_p9 }
 0xbac   : > { %5178 = shalt.err (!%p5175_p7)
}
 0xbad   : > { %s5289_s28 = smov 128  }
 0xbae   : > { %4591 = dma.vmem_to_hbm [thread:$0]  (%p4638_p5), %s3908_s13, 256, %s6492_s17, [#allocation5], %s5289_s28, %s5289_s28, %s5286_s19  }
 0xbaf   : > { %5232 = dma.done.wait (%p4638_p5), [#allocation5], 256  }
 0xbb0   : > { %5234 = vsyncadd (%p4638_p5), [#allocation5], 4294967040 }
 0xbb1 PF: > { %s43_s30 = sadd.s32 1, %s5257_s30   ;;  %s6493_s10 = sld [smem:[#allocation33_spill]] }
 0xbb2   : > { %p40_p2 = scmp.ge.s32.totalorder %s43_s30, 4   ;;  %s6494_s27 = sld [smem:[#allocation36_spill]] }
 0xbb3   : > { %s6495_s16 = sld [smem:[#allocation35_spill]]  ;;  %s6496_s25 = smov %s5241_s26 }
 0xbb4   : > { %s6498_s28 = smov %s5253_s29  ;;  %42 = sbr.rel (!%p40_p2) target bundleno = 26 (0x1a), region = 255 }
 0xbb7   : > { %s6497_s26 = smov %s6493_s10 }
 0xbb9   : > { %s6499_s29 = smov %s6495_s16 }
 0xbbb   :  { %3923 = vsyncpa [#allocation4], 1 }
 0xbbc   :  { %3925 = vsyncpa [#allocation4 + $0x1], 1 }
 0xbbd   :  { %3926 = vsyncpa [#allocation7], 1 }
 0xbbe   :  { %3928 = vsyncpa [#allocation7 + $0x1], 1 }
 0xbbf   :  { %3929 = vsyncpa [#allocation10], 1 }
 0xbc0   :  { %3931 = vsyncpa [#allocation10 + $0x1], 1 }
 0xbc1   :  { %3932 = vsyncpa [#allocation13], 1 }
 0xbc2   :  { %3934 = vsyncpa [#allocation13 + $0x1], 1 }
 0xbc3   :  { %3935 = vsyncpa [#allocation16], 1 }
 0xbc4   :  { %3937 = vsyncpa [#allocation16 + $0x1], 1 }
 0xbc5   :  { %3938 = vsyncpa [#allocation19], 1 }
 0xbc6   :  { %3940 = vsyncpa [#allocation19 + $0x1], 1 }
 0xbc7   :  { %3941 = vsyncpa [#allocation22], 1 }
 0xbc8   :  { %3943 = vsyncpa [#allocation22 + $0x1], 1 }
 0xbc9   :  { %3944 = vsyncpa [#allocation5], 1 }
 0xbca   :  { %3946 = vsyncpa [#allocation5 + $0x1], 1 }

</bundles_post_ra>
